<compile_context>
chip_gen: v7x
topology: tpu7x:2x2x1
jax: 0.10.0
libtpu: 0.0.40
codegen_flags: <defaults>
</compile_context>

<pallas_src>
import functools

import jax
import jax.numpy as jnp
from jax.experimental import pallas as pl
from jax.experimental.pallas import tpu as pltpu

# ----------------------------- config (small, synthetic) -----------------------------
IN_DIM = 128                     # feature_dim of CrossAttentionFusion / LayerNorm
OUT_DIM = 128                    # fc output dim (kept lane-dense)
FFN_DIM = 4 * IN_DIM             # FeedForward hidden size
# TODO(synk): the FeedForward class definition is not in the spec; a standard
# Linear->GELU->Linear (4x hidden) MLP with eval-mode (identity) dropout is assumed.
FC_HID = IN_DIM // 4             # nn.Linear(in_dim, in_dim // 4)  (padded to 128 lanes)
SEQ = 17                         # 16 "remaining" tokens + 1 trailing global token
BATCH = 16
LN_EPS = 1e-5

# packed-bias lane offsets (all multiples of 128 -> static slices are free views)
_OFF_BQ, _OFF_BK, _OFF_BV, _OFF_BFU = 0, IN_DIM, 2 * IN_DIM, 3 * IN_DIM
_OFF_BFF2, _OFF_LNW, _OFF_LNB = 4 * IN_DIM, 5 * IN_DIM, 6 * IN_DIM
_OFF_BFC1, _OFF_BFC2, _OFF_BFF1 = 7 * IN_DIM, 8 * IN_DIM, 9 * IN_DIM
_BIAS_TOTAL = 9 * IN_DIM + FFN_DIM


# ----------------------------- fused Pallas kernel -----------------------------
def _gata_fused_kernel(g_ref, r_ref, wqkv_ref, wfu_ref, wff1_ref, wff2_ref,
                       wfc_ref, bias_ref, feat_ref, out_ref):
    D = IN_DIM
    g = g_ref[...]                                   # (Bt, D)      global token (f32)
    r = r_ref[...]                                   # (Bt, S-1, D) remaining tokens
    Bt = g.shape[0]
    Sm1 = r.shape[1]

    # bf16 matmul operands (f32 accumulate) -- native MXU dtype on every generation.
    g16 = g.astype(jnp.bfloat16)
    r16 = r.reshape(Bt * Sm1, D).astype(jnp.bfloat16)   # trivially aligned view (Sm1=16)

    # ---- CrossAttentionFusion ----------------------------------------------------
    q = (jnp.dot(g16, wqkv_ref[:, :D], preferred_element_type=jnp.float32)
         + bias_ref[:, _OFF_BQ:_OFF_BQ + D])                        # (Bt, D)

    # K projection, scores, softmax (K dies before V is materialized -> low vreg peak)
    k = (jnp.dot(r16, wqkv_ref[:, D:2 * D], preferred_element_type=jnp.float32)
         + bias_ref[:, _OFF_BK:_OFF_BK + D]).reshape(Bt, Sm1, D)
    scale = 1.0 / float(D) ** 0.5
    s = jnp.sum(q[:, None, :] * k, axis=-1) * scale                 # (Bt, Sm1)  VPU+XLU
    m = jnp.max(s, axis=-1, keepdims=True)
    p = jnp.exp(s - m)
    p = p / jnp.sum(p, axis=-1, keepdims=True)                      # exact softmax

    v = (jnp.dot(r16, wqkv_ref[:, 2 * D:], preferred_element_type=jnp.float32)
         + bias_ref[:, _OFF_BV:_OFF_BV + D]).reshape(Bt, Sm1, D)
    attn = jnp.sum(p[:, :, None] * v, axis=1)                       # (Bt, D)   VPU+XLU

    # fusion_layer(cat([feature1, attention_output], -1)): split weight -> 2 matmuls
    fused = (jnp.dot(g16, wfu_ref[:D, :], preferred_element_type=jnp.float32)
             + jnp.dot(attn.astype(jnp.bfloat16), wfu_ref[D:, :],
                       preferred_element_type=jnp.float32)
             + bias_ref[:, _OFF_BFU:_OFF_BFU + D])

    # ---- FeedForward (dropout = identity in eval mode) ---------------------------
    h = (jnp.dot(fused.astype(jnp.bfloat16), wff1_ref[...],
                 preferred_element_type=jnp.float32)
         + bias_ref[:, _OFF_BFF1:_OFF_BFF1 + FFN_DIM])
    # TODO(synk): torch nn.GELU() default is exact erf; tanh approximation used here.
    h = jax.nn.gelu(h, approximate=True)
    ff = (jnp.dot(h.astype(jnp.bfloat16), wff2_ref[...],
                  preferred_element_type=jnp.float32)
          + bias_ref[:, _OFF_BFF2:_OFF_BFF2 + D])

    # ---- LayerNorm (f32) ----------------------------------------------------------
    mu = jnp.mean(ff, axis=-1, keepdims=True)
    xc = ff - mu
    var = jnp.mean(xc * xc, axis=-1, keepdims=True)
    feat = (xc * jax.lax.rsqrt(var + LN_EPS)
            * bias_ref[:, _OFF_LNW:_OFF_LNW + D]
            + bias_ref[:, _OFF_LNB:_OFF_LNB + D])
    feat_ref[...] = feat                                            # (Bt, D) lane-dense

    # ---- fc head: Linear -> ReLU -> Linear (hidden padded 32->128 lanes; exact) ---
    h2 = (jnp.dot(feat.astype(jnp.bfloat16), wfc_ref[:, :D],
                  preferred_element_type=jnp.float32)
          + bias_ref[:, _OFF_BFC1:_OFF_BFC1 + D])
    h2 = jnp.maximum(h2, 0.0)          # padded hidden units are relu(0) = 0
    out_ref[...] = (jnp.dot(h2.astype(jnp.bfloat16), wfc_ref[:, D:],
                            preferred_element_type=jnp.float32)
                    + bias_ref[:, _OFF_BFC2:_OFF_BFC2 + OUT_DIM])   # (Bt, OUT) lane-dense


# ----------------------------- wrapper / pallas_call -----------------------------
def _pick_batch_tile(batch):
    """1 grid step on single-TC chips (v5e/v6e); 2 'parallel' tiles on v7x."""
    try:
        kind = jax.devices()[0].device_kind.lower()
    except Exception:  # pragma: no cover
        kind = ""
    two_core = ("v7" in kind) or ("7x" in kind)
    if two_core and batch % 2 == 0:
        return batch // 2
    return batch


def pack_params(p):
    """Consolidate the 17 logical parameters into 6 kernel operands."""
    D, OUT, HID = IN_DIM, OUT_DIM, FC_HID
    bf16 = jnp.bfloat16
    w_qkv = jnp.concatenate([p["w_q"], p["w_k"], p["w_v"]], axis=1).astype(bf16)
    w_fuse = p["w_fuse"].astype(bf16)
    w_ff1 = p["w_ff1"].astype(bf16)
    w_ff2 = p["w_ff2"].astype(bf16)
    # Pad the fc head hidden dim 32 -> 128 lanes. Exact: padded bias entries are 0 so
    # the padded hidden units are relu(0)=0, and they only meet zero rows of w_fc2.
    w_fc1p = jnp.zeros((D, D), jnp.float32).at[:, :HID].set(p["w_fc1"])
    w_fc2p = jnp.zeros((D, OUT), jnp.float32).at[:HID, :].set(p["w_fc2"])
    w_fc = jnp.concatenate([w_fc1p, w_fc2p], axis=1).astype(bf16)
    b_fc1p = jnp.zeros((D,), jnp.float32).at[:HID].set(p["b_fc1"])
    biases = jnp.concatenate([
        p["b_q"], p["b_k"], p["b_v"], p["b_fuse"], p["b_ff2"],
        p["ln_w"], p["ln_b"], b_fc1p, p["b_fc2"], p["b_ff1"]], axis=0)[None, :]
    assert biases.shape == (1, _BIAS_TOTAL)
    return (w_qkv, w_fuse, w_ff1, w_ff2, w_fc, biases.astype(jnp.float32))


def gata_pallas(packed, g, r):
    """g: [B, D] global token, r: [B, S-1, D] remaining tokens.
    Returns (layernormed features [B, D], fc output [B, OUT_DIM])."""
    B, D = g.shape
    Sm1 = r.shape[1]
    bt = _pick_batch_tile(B)
    grid = (B // bt,)

    in_specs = [
        pl.BlockSpec((bt, D), lambda i: (i, 0)),
        pl.BlockSpec((bt, Sm1, D), lambda i: (i, 0, 0)),
    ]
    in_specs += [pl.BlockSpec(w.shape, lambda i: (0, 0)) for w in packed]
    out_specs = (pl.BlockSpec((bt, D), lambda i: (i, 0)),
                 pl.BlockSpec((bt, OUT_DIM), lambda i: (i, 0)))
    out_shape = (jax.ShapeDtypeStruct((B, D), jnp.float32),
                 jax.ShapeDtypeStruct((B, OUT_DIM), jnp.float32))

    return pl.pallas_call(
        _gata_fused_kernel,
        grid=grid,
        in_specs=in_specs,
        out_specs=out_specs,
        out_shape=out_shape,
        compiler_params=pltpu.CompilerParams(dimension_semantics=("parallel",)),
    )(g, r, *packed)


# ----------------------------- glue: full GATA forward -----------------------------
def _pca_batch(X, k):
    """pca_torch_batch equivalent.  X: (batch, num_features, feature_dim)."""
    Xc = X - X.mean(axis=2, keepdims=True)

    def one(xc):
        cov = (xc.T @ xc) / (xc.shape[0] - 1)
        evals, evecs = jnp.linalg.eigh(cov)
        order = jnp.argsort(-evals)
        pcs = evecs[:, order[:k]]
        return xc @ pcs

    return jax.vmap(one)(Xc)


def gata_forward(params, pi_total_vector, global_act=True):
    """Matches GATA.forward: split global/remaining tokens, cross-attend, FFN, LN, head."""
    packed = pack_params(params)
    g = pi_total_vector[:, -1, :]        # (B, D)   feature1 (seq_len1 = 1)
    r = pi_total_vector[:, :-1, :]       # (B, S-1, D) feature2
    feat, fc_out = gata_pallas(packed, g, r)
    if global_act:
        # cross_attender(...).permute(1,0,2) gives (1, B, D); fc keeps the leading 1.
        return fc_out[None]              # (1, B, OUT_DIM)
    # TODO(synk): torch.linalg.eigh has no Pallas TPU equivalent; PCA runs in plain JAX.
    return _pca_batch(feat[None], OUT_DIM)


# ----------------------------- deterministic parameter init -----------------------------
def init_params(key):
    ks = iter(jax.random.split(key, 24))

    def w(shape, scale=0.02):
        return scale * jax.random.normal(next(ks), shape, jnp.float32)

    D, FF, HID, OUT = IN_DIM, FFN_DIM, FC_HID, OUT_DIM
    return dict(
        w_q=w((D, D)), b_q=w((D,), 0.01),
        w_k=w((D, D)), b_k=w((D,), 0.01),
        w_v=w((D, D)), b_v=w((D,), 0.01),
        w_fuse=w((2 * D, D)), b_fuse=w((D,), 0.01),
        w_ff1=w((D, FF)), b_ff1=w((FF,), 0.01),
        w_ff2=w((FF, D)), b_ff2=w((D,), 0.01),
        ln_w=jnp.ones((D,), jnp.float32), ln_b=jnp.zeros((D,), jnp.float32),
        w_fc1=w((D, HID)), b_fc1=w((HID,), 0.01),
        w_fc2=w((HID, OUT)), b_fc2=w((OUT,), 0.01),
    )


# ----------------------------- demo -----------------------------
if __name__ == "__main__":
    root = jax.random.PRNGKey(0)
    pkey, xkey = jax.random.split(root)
    params = init_params(pkey)

    # pi_total_vector: (batch, seq, feature_dim); last token is the "global" vector.
    x = jax.random.normal(xkey, (BATCH, SEQ, IN_DIM), jnp.float32)

    fwd = jax.jit(functools.partial(gata_forward, global_act=True))
    out = fwd(params, x)
    jax.block_until_ready(out)

    assert out.shape == (1, BATCH, OUT_DIM)
    assert bool(jnp.all(jnp.isfinite(out)))
    print("KERNEL_OK")
</pallas_src>

<mosaic_0001>
module attributes {stable_mosaic.version = 11 : i64} {
  func.func @_gata_fused_kernel(%arg0: i32, %arg1: memref<16x128xf32, #tpu.memory_space<vmem>>, %arg2: memref<16x16x128xf32, #tpu.memory_space<vmem>>, %arg3: memref<128x384xbf16, #tpu.memory_space<vmem>>, %arg4: memref<256x128xbf16, #tpu.memory_space<vmem>>, %arg5: memref<128x512xbf16, #tpu.memory_space<vmem>>, %arg6: memref<512x128xbf16, #tpu.memory_space<vmem>>, %arg7: memref<128x256xbf16, #tpu.memory_space<vmem>>, %arg8: memref<1x1664xf32, #tpu.memory_space<vmem>>, %arg9: memref<16x128xf32, #tpu.memory_space<vmem>>, %arg10: memref<16x128xf32, #tpu.memory_space<vmem>>) attributes {dimension_semantics = [#tpu.dimension_semantics<parallel>], iteration_bounds = array<i64: 1>, scalar_prefetch = 0 : i64, scratch_operands = 0 : i64, tpu.core_type = #tpu.core_type<tc>, window_params = [{transform_indices = @transform_0, window_bounds = array<i64: 16, 128>}, {transform_indices = @transform_1, window_bounds = array<i64: 16, 16, 128>}, {pipeline_mode = #tpu.pipeline_mode<synchronous>, transform_indices = @transform_2, window_bounds = array<i64: 128, 384>}, {pipeline_mode = #tpu.pipeline_mode<synchronous>, transform_indices = @transform_3, window_bounds = array<i64: 256, 128>}, {pipeline_mode = #tpu.pipeline_mode<synchronous>, transform_indices = @transform_4, window_bounds = array<i64: 128, 512>}, {pipeline_mode = #tpu.pipeline_mode<synchronous>, transform_indices = @transform_5, window_bounds = array<i64: 512, 128>}, {pipeline_mode = #tpu.pipeline_mode<synchronous>, transform_indices = @transform_6, window_bounds = array<i64: 128, 256>}, {pipeline_mode = #tpu.pipeline_mode<synchronous>, transform_indices = @transform_7, window_bounds = array<i64: 1, 1664>}, {transform_indices = @transform_8, window_bounds = array<i64: 16, 128>}, {transform_indices = @transform_9, window_bounds = array<i64: 16, 128>}]} {
    %c0 = arith.constant 0 : index
    %c0_0 = arith.constant 0 : index
    %0 = vector.load %arg1[%c0, %c0_0] : memref<16x128xf32, #tpu.memory_space<vmem>>, vector<16x128xf32>
    %c0_1 = arith.constant 0 : index
    %c0_2 = arith.constant 0 : index
    %c0_3 = arith.constant 0 : index
    %1 = vector.load %arg2[%c0_1, %c0_2, %c0_3] : memref<16x16x128xf32, #tpu.memory_space<vmem>>, vector<16x16x128xf32>
    %2 = arith.truncf %0 : vector<16x128xf32> to vector<16x128xbf16>
    %3 = vector.shape_cast %1 : vector<16x16x128xf32> to vector<256x128xf32>
    %4 = arith.truncf %3 : vector<256x128xf32> to vector<256x128xbf16>
    %c0_4 = arith.constant 0 : index
    %c0_5 = arith.constant 0 : index
    %5 = vector.load %arg3[%c0_4, %c0_5] : memref<128x384xbf16, #tpu.memory_space<vmem>>, vector<128x128xbf16>
    %cst = arith.constant dense<0.000000e+00> : vector<16x128xf32>
    %6 = tpu.matmul %2, %5, %cst {dimension_numbers = #tpu.dot_dimension_numbers<[1], [0], [0], [1], [0, 0, 1, 1], [], []>} : vector<16x128xbf16>, vector<128x128xbf16>, vector<16x128xf32> -> vector<16x128xf32>
    %c0_6 = arith.constant 0 : index
    %c0_7 = arith.constant 0 : index
    %7 = vector.load %arg8[%c0_6, %c0_7] : memref<1x1664xf32, #tpu.memory_space<vmem>>, vector<1x128xf32>
    %8 = vector.broadcast %7 : vector<1x128xf32> to vector<16x128xf32>
    %9 = arith.addf %6, %8 : vector<16x128xf32>
    %c0_8 = arith.constant 0 : index
    %c128 = arith.constant 128 : index
    %10 = vector.load %arg3[%c0_8, %c128] : memref<128x384xbf16, #tpu.memory_space<vmem>>, vector<128x128xbf16>
    %cst_9 = arith.constant dense<0.000000e+00> : vector<256x128xf32>
    %11 = tpu.matmul %4, %10, %cst_9 {dimension_numbers = #tpu.dot_dimension_numbers<[1], [0], [0], [1], [0, 0, 1, 1], [], []>} : vector<256x128xbf16>, vector<128x128xbf16>, vector<256x128xf32> -> vector<256x128xf32>
    %c0_10 = arith.constant 0 : index
    %c128_11 = arith.constant 128 : index
    %12 = vector.load %arg8[%c0_10, %c128_11] : memref<1x1664xf32, #tpu.memory_space<vmem>>, vector<1x128xf32>
    %13 = vector.broadcast %12 : vector<1x128xf32> to vector<256x128xf32>
    %14 = arith.addf %11, %13 : vector<256x128xf32>
    %15 = vector.shape_cast %14 : vector<256x128xf32> to vector<16x16x128xf32>
    %16 = vector.shape_cast %9 : vector<16x128xf32> to vector<16x1x128xf32>
    %17 = vector.broadcast %16 : vector<16x1x128xf32> to vector<16x16x128xf32>
    %18 = arith.mulf %17, %15 : vector<16x16x128xf32>
    %cst_12 = arith.constant dense<0.000000e+00> : vector<16x16xf32>
    %19 = vector.multi_reduction <add>, %18, %cst_12 [2] : vector<16x16x128xf32> to vector<16x16xf32>
    %cst_13 = arith.constant 0.0883883461 : f32
    %20 = vector.broadcast %cst_13 : f32 to vector<16x16xf32>
    %21 = arith.mulf %19, %20 : vector<16x16xf32>
    %cst_14 = arith.constant dense<0xFF800000> : vector<16xf32>
    %22 = vector.multi_reduction <maximumf>, %21, %cst_14 [1] : vector<16x16xf32> to vector<16xf32>
    %23 = vector.shape_cast %22 : vector<16xf32> to vector<16x1xf32>
    %24 = vector.broadcast %23 : vector<16x1xf32> to vector<16x16xf32>
    %25 = arith.subf %21, %24 : vector<16x16xf32>
    %26 = math.exp %25 : vector<16x16xf32>
    %cst_15 = arith.constant dense<0.000000e+00> : vector<16xf32>
    %27 = vector.multi_reduction <add>, %26, %cst_15 [1] : vector<16x16xf32> to vector<16xf32>
    %28 = vector.shape_cast %27 : vector<16xf32> to vector<16x1xf32>
    %29 = vector.broadcast %28 : vector<16x1xf32> to vector<16x16xf32>
    %30 = arith.divf %26, %29 : vector<16x16xf32>
    %c0_16 = arith.constant 0 : index
    %c256 = arith.constant 256 : index
    %31 = vector.load %arg3[%c0_16, %c256] : memref<128x384xbf16, #tpu.memory_space<vmem>>, vector<128x128xbf16>
    %cst_17 = arith.constant dense<0.000000e+00> : vector<256x128xf32>
    %32 = tpu.matmul %4, %31, %cst_17 {dimension_numbers = #tpu.dot_dimension_numbers<[1], [0], [0], [1], [0, 0, 1, 1], [], []>} : vector<256x128xbf16>, vector<128x128xbf16>, vector<256x128xf32> -> vector<256x128xf32>
    %c0_18 = arith.constant 0 : index
    %c256_19 = arith.constant 256 : index
    %33 = vector.load %arg8[%c0_18, %c256_19] : memref<1x1664xf32, #tpu.memory_space<vmem>>, vector<1x128xf32>
    %34 = vector.broadcast %33 : vector<1x128xf32> to vector<256x128xf32>
    %35 = arith.addf %32, %34 : vector<256x128xf32>
    %36 = vector.shape_cast %35 : vector<256x128xf32> to vector<16x16x128xf32>
    %37 = vector.shape_cast %30 : vector<16x16xf32> to vector<16x16x1xf32>
    %38 = vector.broadcast %37 : vector<16x16x1xf32> to vector<16x16x128xf32>
    %39 = arith.mulf %38, %36 : vector<16x16x128xf32>
    %cst_20 = arith.constant dense<0.000000e+00> : vector<16x128xf32>
    %40 = vector.multi_reduction <add>, %39, %cst_20 [1] : vector<16x16x128xf32> to vector<16x128xf32>
    %c0_21 = arith.constant 0 : index
    %c0_22 = arith.constant 0 : index
    %41 = vector.load %arg4[%c0_21, %c0_22] : memref<256x128xbf16, #tpu.memory_space<vmem>>, vector<128x128xbf16>
    %cst_23 = arith.constant dense<0.000000e+00> : vector<16x128xf32>
    %42 = tpu.matmul %2, %41, %cst_23 {dimension_numbers = #tpu.dot_dimension_numbers<[1], [0], [0], [1], [0, 0, 1, 1], [], []>} : vector<16x128xbf16>, vector<128x128xbf16>, vector<16x128xf32> -> vector<16x128xf32>
    %43 = arith.truncf %40 : vector<16x128xf32> to vector<16x128xbf16>
    %c128_24 = arith.constant 128 : index
    %c0_25 = arith.constant 0 : index
    %44 = vector.load %arg4[%c128_24, %c0_25] : memref<256x128xbf16, #tpu.memory_space<vmem>>, vector<128x128xbf16>
    %cst_26 = arith.constant dense<0.000000e+00> : vector<16x128xf32>
    %45 = tpu.matmul %43, %44, %cst_26 {dimension_numbers = #tpu.dot_dimension_numbers<[1], [0], [0], [1], [0, 0, 1, 1], [], []>} : vector<16x128xbf16>, vector<128x128xbf16>, vector<16x128xf32> -> vector<16x128xf32>
    %46 = arith.addf %42, %45 : vector<16x128xf32>
    %c0_27 = arith.constant 0 : index
    %c384 = arith.constant 384 : index
    %47 = vector.load %arg8[%c0_27, %c384] : memref<1x1664xf32, #tpu.memory_space<vmem>>, vector<1x128xf32>
    %48 = vector.broadcast %47 : vector<1x128xf32> to vector<16x128xf32>
    %49 = arith.addf %46, %48 : vector<16x128xf32>
    %50 = arith.truncf %49 : vector<16x128xf32> to vector<16x128xbf16>
    %c0_28 = arith.constant 0 : index
    %c0_29 = arith.constant 0 : index
    %51 = vector.load %arg5[%c0_28, %c0_29] : memref<128x512xbf16, #tpu.memory_space<vmem>>, vector<128x512xbf16>
    %cst_30 = arith.constant dense<0.000000e+00> : vector<16x512xf32>
    %52 = tpu.matmul %50, %51, %cst_30 {dimension_numbers = #tpu.dot_dimension_numbers<[1], [0], [0], [1], [0, 0, 1, 1], [], []>} : vector<16x128xbf16>, vector<128x512xbf16>, vector<16x512xf32> -> vector<16x512xf32>
    %c0_31 = arith.constant 0 : index
    %c1152 = arith.constant 1152 : index
    %53 = vector.load %arg8[%c0_31, %c1152] : memref<1x1664xf32, #tpu.memory_space<vmem>>, vector<1x512xf32>
    %54 = vector.broadcast %53 : vector<1x512xf32> to vector<16x512xf32>
    %55 = arith.addf %52, %54 : vector<16x512xf32>
    %56 = arith.mulf %55, %55 : vector<16x512xf32>
    %57 = arith.mulf %55, %56 : vector<16x512xf32>
    %cst_32 = arith.constant 4.471500e-02 : f32
    %58 = vector.broadcast %cst_32 : f32 to vector<16x512xf32>
    %59 = arith.mulf %58, %57 : vector<16x512xf32>
    %60 = arith.addf %55, %59 : vector<16x512xf32>
    %cst_33 = arith.constant 0.797884583 : f32
    %61 = vector.broadcast %cst_33 : f32 to vector<16x512xf32>
    %62 = arith.mulf %61, %60 : vector<16x512xf32>
    %63 = math.tanh %62 : vector<16x512xf32>
    %cst_34 = arith.constant 1.000000e+00 : f32
    %64 = vector.broadcast %cst_34 : f32 to vector<16x512xf32>
    %65 = arith.addf %64, %63 : vector<16x512xf32>
    %cst_35 = arith.constant 5.000000e-01 : f32
    %66 = vector.broadcast %cst_35 : f32 to vector<16x512xf32>
    %67 = arith.mulf %66, %65 : vector<16x512xf32>
    %68 = arith.mulf %55, %67 : vector<16x512xf32>
    %69 = arith.truncf %68 : vector<16x512xf32> to vector<16x512xbf16>
    %c0_36 = arith.constant 0 : index
    %c0_37 = arith.constant 0 : index
    %70 = vector.load %arg6[%c0_36, %c0_37] : memref<512x128xbf16, #tpu.memory_space<vmem>>, vector<512x128xbf16>
    %cst_38 = arith.constant dense<0.000000e+00> : vector<16x128xf32>
    %71 = tpu.matmul %69, %70, %cst_38 {dimension_numbers = #tpu.dot_dimension_numbers<[1], [0], [0], [1], [0, 0, 1, 1], [], []>} : vector<16x512xbf16>, vector<512x128xbf16>, vector<16x128xf32> -> vector<16x128xf32>
    %c0_39 = arith.constant 0 : index
    %c512 = arith.constant 512 : index
    %72 = vector.load %arg8[%c0_39, %c512] : memref<1x1664xf32, #tpu.memory_space<vmem>>, vector<1x128xf32>
    %73 = vector.broadcast %72 : vector<1x128xf32> to vector<16x128xf32>
    %74 = arith.addf %71, %73 : vector<16x128xf32>
    %cst_40 = arith.constant dense<0.000000e+00> : vector<16xf32>
    %75 = vector.multi_reduction <add>, %74, %cst_40 [1] : vector<16x128xf32> to vector<16xf32>
    %76 = vector.shape_cast %75 : vector<16xf32> to vector<16x1xf32>
    %cst_41 = arith.constant 1.280000e+02 : f32
    %77 = vector.broadcast %cst_41 : f32 to vector<16x1xf32>
    %78 = arith.divf %76, %77 : vector<16x1xf32>
    %79 = vector.broadcast %78 : vector<16x1xf32> to vector<16x128xf32>
    %80 = arith.subf %74, %79 : vector<16x128xf32>
    %81 = arith.mulf %80, %80 : vector<16x128xf32>
    %cst_42 = arith.constant dense<0.000000e+00> : vector<16xf32>
    %82 = vector.multi_reduction <add>, %81, %cst_42 [1] : vector<16x128xf32> to vector<16xf32>
    %83 = vector.shape_cast %82 : vector<16xf32> to vector<16x1xf32>
    %cst_43 = arith.constant 1.280000e+02 : f32
    %84 = vector.broadcast %cst_43 : f32 to vector<16x1xf32>
    %85 = arith.divf %83, %84 : vector<16x1xf32>
    %cst_44 = arith.constant 9.99999974E-6 : f32
    %86 = vector.broadcast %cst_44 : f32 to vector<16x1xf32>
    %87 = arith.addf %85, %86 : vector<16x1xf32>
    %88 = math.rsqrt %87 : vector<16x1xf32>
    %89 = vector.broadcast %88 : vector<16x1xf32> to vector<16x128xf32>
    %90 = arith.mulf %80, %89 : vector<16x128xf32>
    %c0_45 = arith.constant 0 : index
    %c640 = arith.constant 640 : index
    %91 = vector.load %arg8[%c0_45, %c640] : memref<1x1664xf32, #tpu.memory_space<vmem>>, vector<1x128xf32>
    %92 = vector.broadcast %91 : vector<1x128xf32> to vector<16x128xf32>
    %93 = arith.mulf %90, %92 : vector<16x128xf32>
    %c0_46 = arith.constant 0 : index
    %c768 = arith.constant 768 : index
    %94 = vector.load %arg8[%c0_46, %c768] : memref<1x1664xf32, #tpu.memory_space<vmem>>, vector<1x128xf32>
    %95 = vector.broadcast %94 : vector<1x128xf32> to vector<16x128xf32>
    %96 = arith.addf %93, %95 : vector<16x128xf32>
    %c0_47 = arith.constant 0 : index
    %c0_48 = arith.constant 0 : index
    %97 = vector.load %arg9[%c0_47, %c0_48] : memref<16x128xf32, #tpu.memory_space<vmem>>, vector<16x128xf32>
    tpu.vector_store %arg9[%c0_47, %c0_48], %96 {strides = array<i32>} : memref<16x128xf32, #tpu.memory_space<vmem>>, vector<16x128xf32>,
    %98 = arith.truncf %96 : vector<16x128xf32> to vector<16x128xbf16>
    %c0_49 = arith.constant 0 : index
    %c0_50 = arith.constant 0 : index
    %99 = vector.load %arg7[%c0_49, %c0_50] : memref<128x256xbf16, #tpu.memory_space<vmem>>, vector<128x128xbf16>
    %cst_51 = arith.constant dense<0.000000e+00> : vector<16x128xf32>
    %100 = tpu.matmul %98, %99, %cst_51 {dimension_numbers = #tpu.dot_dimension_numbers<[1], [0], [0], [1], [0, 0, 1, 1], [], []>} : vector<16x128xbf16>, vector<128x128xbf16>, vector<16x128xf32> -> vector<16x128xf32>
    %c0_52 = arith.constant 0 : index
    %c896 = arith.constant 896 : index
    %101 = vector.load %arg8[%c0_52, %c896] : memref<1x1664xf32, #tpu.memory_space<vmem>>, vector<1x128xf32>
    %102 = vector.broadcast %101 : vector<1x128xf32> to vector<16x128xf32>
    %103 = arith.addf %100, %102 : vector<16x128xf32>
    %cst_53 = arith.constant 0.000000e+00 : f32
    %104 = vector.broadcast %cst_53 : f32 to vector<16x128xf32>
    %105 = arith.maximumf %103, %104 : vector<16x128xf32>
    %106 = arith.truncf %105 : vector<16x128xf32> to vector<16x128xbf16>
    %c0_54 = arith.constant 0 : index
    %c128_55 = arith.constant 128 : index
    %107 = vector.load %arg7[%c0_54, %c128_55] : memref<128x256xbf16, #tpu.memory_space<vmem>>, vector<128x128xbf16>
    %cst_56 = arith.constant dense<0.000000e+00> : vector<16x128xf32>
    %108 = tpu.matmul %106, %107, %cst_56 {dimension_numbers = #tpu.dot_dimension_numbers<[1], [0], [0], [1], [0, 0, 1, 1], [], []>} : vector<16x128xbf16>, vector<128x128xbf16>, vector<16x128xf32> -> vector<16x128xf32>
    %c0_57 = arith.constant 0 : index
    %c1024 = arith.constant 1024 : index
    %109 = vector.load %arg8[%c0_57, %c1024] : memref<1x1664xf32, #tpu.memory_space<vmem>>, vector<1x128xf32>
    %110 = vector.broadcast %109 : vector<1x128xf32> to vector<16x128xf32>
    %111 = arith.addf %108, %110 : vector<16x128xf32>
    %c0_58 = arith.constant 0 : index
    %c0_59 = arith.constant 0 : index
    %112 = vector.load %arg10[%c0_58, %c0_59] : memref<16x128xf32, #tpu.memory_space<vmem>>, vector<16x128xf32>
    tpu.vector_store %arg10[%c0_58, %c0_59], %111 {strides = array<i32>} : memref<16x128xf32, #tpu.memory_space<vmem>>, vector<16x128xf32>,
    return
  }
  func.func @transform_0(%arg0: i32) -> (i32, i32) {
    %c0_i32 = arith.constant 0 : i32
    %c0_i32_0 = arith.constant 0 : i32
    return %arg0, %c0_i32 : i32, i32
  }
  func.func @transform_1(%arg0: i32) -> (i32, i32, i32) {
    %c0_i32 = arith.constant 0 : i32
    %c0_i32_0 = arith.constant 0 : i32
    %c0_i32_1 = arith.constant 0 : i32
    return %arg0, %c0_i32, %c0_i32_0 : i32, i32, i32
  }
  func.func @transform_2(%arg0: i32) -> (i32, i32) {
    %c0_i32 = arith.constant 0 : i32
    %c0_i32_0 = arith.constant 0 : i32
    %c0_i32_1 = arith.constant 0 : i32
    return %c0_i32, %c0_i32_0 : i32, i32
  }
  func.func @transform_3(%arg0: i32) -> (i32, i32) {
    %c0_i32 = arith.constant 0 : i32
    %c0_i32_0 = arith.constant 0 : i32
    %c0_i32_1 = arith.constant 0 : i32
    return %c0_i32, %c0_i32_0 : i32, i32
  }
  func.func @transform_4(%arg0: i32) -> (i32, i32) {
    %c0_i32 = arith.constant 0 : i32
    %c0_i32_0 = arith.constant 0 : i32
    %c0_i32_1 = arith.constant 0 : i32
    return %c0_i32, %c0_i32_0 : i32, i32
  }
  func.func @transform_5(%arg0: i32) -> (i32, i32) {
    %c0_i32 = arith.constant 0 : i32
    %c0_i32_0 = arith.constant 0 : i32
    %c0_i32_1 = arith.constant 0 : i32
    return %c0_i32, %c0_i32_0 : i32, i32
  }
  func.func @transform_6(%arg0: i32) -> (i32, i32) {
    %c0_i32 = arith.constant 0 : i32
    %c0_i32_0 = arith.constant 0 : i32
    %c0_i32_1 = arith.constant 0 : i32
    return %c0_i32, %c0_i32_0 : i32, i32
  }
  func.func @transform_7(%arg0: i32) -> (i32, i32) {
    %c0_i32 = arith.constant 0 : i32
    %c0_i32_0 = arith.constant 0 : i32
    %c0_i32_1 = arith.constant 0 : i32
    return %c0_i32, %c0_i32_0 : i32, i32
  }
  func.func @transform_8(%arg0: i32) -> (i32, i32) {
    %c0_i32 = arith.constant 0 : i32
    %c0_i32_0 = arith.constant 0 : i32
    return %arg0, %c0_i32 : i32, i32
  }
  func.func @transform_9(%arg0: i32) -> (i32, i32) {
    %c0_i32 = arith.constant 0 : i32
    %c0_i32_0 = arith.constant 0 : i32
    return %arg0, %c0_i32 : i32, i32
  }
}

</mosaic_0001>

<bundles_post_ra>
// kernel: custom-call
= control target key start
LH: loop header
LB: loop body
LE: loop exit
PB: predicated region body
PF: predicated region fallthrough
CT: control target
= control target key end

     0   :  { %s6_s0 = inlined_call_operand.vmem [shape: f32[1664], index: 0, kind: output, shape index: {}]  }

// kernel: gata_forward.1
= control target key start
LH: loop header
LB: loop body
LE: loop exit
PB: predicated region body
PF: predicated region fallthrough
CT: control target
= control target key end

     0   :  { %15 = vsyncpa [#allocation3], 0  ;;  %v5619_v0 = vmov 0.0   ;;  %vm4168_vm0 = vmmov 0   ;;  %s5609_s0 = inlined_call_operand.vmem [shape: f32[16,128], index: 0, kind: input, shape index: {}]   ;;  %s5610_s1 = inlined_call_operand.vmem [shape: f32[16,16,128], index: 1, kind: input, shape index: {}]   ;;  %s5611_s2 = inlined_call_operand.vmem [shape: bf16[128,384], index: 2, kind: input, shape index: {}]   ;;  %s5612_s3 = inlined_call_operand.vmem [shape: bf16[256,128], index: 3, kind: input, shape index: {}]   ;;  %s5613_s4 = inlined_call_operand.vmem [shape: bf16[128,512], index: 4, kind: input, shape index: {}]   ;;  %s5614_s5 = inlined_call_operand.vmem [shape: bf16[512,128], index: 5, kind: input, shape index: {}]   ;;  %s5615_s6 = inlined_call_operand.vmem [shape: bf16[128,256], index: 6, kind: input, shape index: {}]   ;;  %s5616_s7 = inlined_call_operand.vmem [shape: f32[1,1664], index: 7, kind: input, shape index: {}]   ;;  %s5617_s8 = inlined_call_operand.hbm [shape: f32[16,128], index: 8, kind: output, shape index: {0}]   ;;  %s5618_s9 = inlined_call_operand.hbm [shape: f32[16,128], index: 9, kind: output, shape index: {1}]  }
   0x1   :  { %3661 = vmatprep.subr.bf16.mxu0 %v5619_v0  ;;  %v3867_v1 = vld [vmem:[%s5611_s2] ss:$12 sps:$4 sm:$0xff]   ;;  %3677 = vmatprep.mubr.msk.bf16.mxu0 %vm4168_vm0, %v5619_v0  ;;  %v3868_v2 = vld [vmem:[%s5611_s2 + $0x4] ss:$12 sps:$4 sm:$0xff]   ;;  %v3870_v4 = vld [vmem:[%s5611_s2 + $0x1c] ss:$12 sps:$4 sm:$0xff]  }
   0x2   :  { %3662 = vmatpush3.bf16.msra.mxu0 %v3867_v1  ;;  %v3869_v3 = vld [vmem:[%s5611_s2 + $0x18] ss:$12 sps:$4 sm:$0xff]   ;;  %3681 = vmatprep.subr.bf16.mxu1 %v3868_v2  ;;  %v3872_v5 = vld [vmem:[%s5611_s2 + $0x34] ss:$12 sps:$4 sm:$0xff]   ;;  %v3871_v6 = vld [vmem:[%s5611_s2 + $0x30] ss:$12 sps:$4 sm:$0xff]  }
   0x3   :  { %3663 = vmatprep.subr.bf16.mxu0 %v5619_v0  ;;  %3682 = vmatpush3.bf16.msra.mxu1 %v3868_v2  ;;  %v3874_v7 = vld [vmem:[%s5611_s2 + $0x4c] ss:$12 sps:$4 sm:$0xff]   ;;  %v3873_v8 = vld [vmem:[%s5611_s2 + $0x48] ss:$12 sps:$4 sm:$0xff]   ;;  %v3876_v9 = vld [vmem:[%s5611_s2 + $0x64] ss:$12 sps:$4 sm:$0xff]  }
   0x4   :  { %3683 = vmatprep.subr.bf16.mxu1 %v3870_v4  ;;  %v3875_v10 = vld [vmem:[%s5611_s2 + $0x60] ss:$12 sps:$4 sm:$0xff]   ;;  %v3878_v13 = vld [vmem:[%s5611_s2 + $0x7c] ss:$12 sps:$4 sm:$0xff]   ;;  %v3877_v15 = vld [vmem:[%s5611_s2 + $0x78] ss:$12 sps:$4 sm:$0xff]  }
   0x5   :  { %v36_v11 = vld [vmem:[%s5610_s1] sm:$0xff]  ;;  %v37_v12 = vld [vmem:[%s5610_s1 + $0x8] sm:$0xff]  ;;  %v3879_v17 = vld [vmem:[%s5611_s2 + $0x90] ss:$12 sps:$4 sm:$0xff]  }
   0x6   :  { %3664 = vmatpush3.bf16.msra.mxu0 %v3869_v3  ;;  %v69_v14 = vpack.c.bf16 %v37_v12, %v36_v11  ;;  %v3880_v16 = vld [vmem:[%s5611_s2 + $0x94] ss:$12 sps:$4 sm:$0xff]   ;;  %v3882_v19 = vld [vmem:[%s5611_s2 + $0xac] ss:$12 sps:$4 sm:$0xff]  }
   0x7   :  { %3665 = vmatprep.subr.bf16.mxu0 %v5619_v0  ;;  %3684 = vmatpush3.bf16.msra.mxu1 %v3870_v4  ;;  %v3881_v18 = vld [vmem:[%s5611_s2 + $0xa8] ss:$12 sps:$4 sm:$0xff]   ;;  %v34_v20 = vld [vmem:[%s5609_s0] sm:$0xff]  ;;  %v39_v23 = vld [vmem:[%s5610_s1 + $0x18] sm:$0xff] }
   0x8   :  { %3685 = vmatprep.subr.bf16.mxu1 %v3872_v5  ;;  %3697 = vmatprep.mubr.bf16.mxu1 %v69_v14  ;;  %v35_v21 = vld [vmem:[%s5609_s0 + $0x8] sm:$0xff]  ;;  %v38_v22 = vld [vmem:[%s5610_s1 + $0x10] sm:$0xff]  ;;  %v40_v24 = vld [vmem:[%s5610_s1 + $0x20] sm:$0xff] }
   0x9   :  { %v41_v25 = vld [vmem:[%s5610_s1 + $0x28] sm:$0xff]  ;;  %v4307_v26 = vpack.c.bf16 %v35_v21, %v34_v20  ;;  %v4309_v27 = vpack.c.bf16 %v39_v23, %v38_v22  ;;  %v42_v29 = vld [vmem:[%s5610_s1 + $0x30] sm:$0xff]  ;;  %v43_v30 = vld [vmem:[%s5610_s1 + $0x38] sm:$0xff] }
   0xa   :  { %3666 = vmatpush3.bf16.msra.mxu0 %v3871_v6  ;;  %v4311_v28 = vpack.c.bf16 %v41_v25, %v40_v24  ;;  %v44_v31 = vld [vmem:[%s5610_s1 + $0x40] sm:$0xff]  ;;  %v45_v32 = vld [vmem:[%s5610_s1 + $0x48] sm:$0xff]  ;;  %v4329_v33 = vpack.c.bf16 %v43_v30, %v42_v29  ;;  %v46_v35 = vld [vmem:[%s5610_s1 + $0x50] sm:$0xff] }
   0xb   :  { %3667 = vmatprep.subr.bf16.mxu0 %v5619_v0  ;;  %3686 = vmatpush3.bf16.msra.mxu1 %v3872_v5  ;;  %5635 = vst [vmem:[#allocation8_spill] sm:$0xff] %v4307_v26  ;;  %v4331_v34 = vpack.c.bf16 %v45_v32, %v44_v31  ;;  %v47_v36 = vld [vmem:[%s5610_s1 + $0x58] sm:$0xff]  ;;  %v48_v37 = vld [vmem:[%s5610_s1 + $0x60] sm:$0xff]  ;;  %v49_v38 = vld [vmem:[%s5610_s1 + $0x68] sm:$0xff] }
   0xc   :  { %3687 = vmatprep.subr.bf16.mxu1 %v3874_v7  ;;  %v4347_v39 = vpack.c.bf16 %v47_v36, %v46_v35  ;;  %v4349_v40 = vpack.c.bf16 %v49_v38, %v48_v37  ;;  %v50_v41 = vld [vmem:[%s5610_s1 + $0x70] sm:$0xff]  ;;  %v51_v42 = vld [vmem:[%s5610_s1 + $0x78] sm:$0xff]  ;;  %v52_v43 = vld [vmem:[%s5610_s1 + $0x80] sm:$0xff] }
   0xd   :  { %v53_v44 = vld [vmem:[%s5610_s1 + $0x88] sm:$0xff]  ;;  %v4365_v45 = vpack.c.bf16 %v51_v42, %v50_v41  ;;  %v54_v47 = vld [vmem:[%s5610_s1 + $0x90] sm:$0xff]  ;;  %v55_v48 = vld [vmem:[%s5610_s1 + $0x98] sm:$0xff] }
   0xe   :  { %3668 = vmatpush3.bf16.msra.mxu0 %v3873_v8  ;;  %v4367_v46 = vpack.c.bf16 %v53_v44, %v52_v43  ;;  %v56_v49 = vld [vmem:[%s5610_s1 + $0xa0] sm:$0xff]  ;;  %v57_v50 = vld [vmem:[%s5610_s1 + $0xa8] sm:$0xff]  ;;  %v4383_v51 = vpack.c.bf16 %v55_v48, %v54_v47  ;;  %v58_v53 = vld [vmem:[%s5610_s1 + $0xb0] sm:$0xff] }
   0xf   :  { %3669 = vmatprep.subr.bf16.mxu0 %v5619_v0  ;;  %3688 = vmatpush3.bf16.msra.mxu1 %v3874_v7  ;;  %v4385_v52 = vpack.c.bf16 %v57_v50, %v56_v49  ;;  %v59_v54 = vld [vmem:[%s5610_s1 + $0xb8] sm:$0xff]  ;;  %v60_v55 = vld [vmem:[%s5610_s1 + $0xc0] sm:$0xff]  ;;  %v61_v56 = vld [vmem:[%s5610_s1 + $0xc8] sm:$0xff] }
  0x10   :  { %3689 = vmatprep.subr.bf16.mxu1 %v3876_v9  ;;  %v4401_v57 = vpack.c.bf16 %v59_v54, %v58_v53  ;;  %v4403_v58 = vpack.c.bf16 %v61_v56, %v60_v55  ;;  %v62_v59 = vld [vmem:[%s5610_s1 + $0xd0] sm:$0xff]  ;;  %v63_v60 = vld [vmem:[%s5610_s1 + $0xd8] sm:$0xff]  ;;  %v64_v61 = vld [vmem:[%s5610_s1 + $0xe0] sm:$0xff] }
  0x11   :  { %v65_v62 = vld [vmem:[%s5610_s1 + $0xe8] sm:$0xff]  ;;  %v4419_v63 = vpack.c.bf16 %v63_v60, %v62_v59  ;;  %v66_v2 = vld [vmem:[%s5610_s1 + $0xf0] sm:$0xff]  ;;  %v67_v3 = vld [vmem:[%s5610_s1 + $0xf8] sm:$0xff] }
  0x12   :  { %3670 = vmatpush3.bf16.msra.mxu0 %v3875_v10  ;;  %5636 = vst [vmem:[#allocation9_spill] sm:$0xff] %v4403_v58  ;;  %v4421_v1 = vpack.c.bf16 %v65_v62, %v64_v61 }
  0x13   :  { %3671 = vmatprep.subr.bf16.mxu0 %v5619_v0  ;;  %3690 = vmatpush3.bf16.msra.mxu1 %v3876_v9  ;;  %5637 = vst [vmem:[#allocation10_spill] sm:$0xff] %v4419_v63 }
  0x14   :  { %3691 = vmatprep.subr.bf16.mxu1 %v3878_v13  ;;  %5638 = vst [vmem:[#allocation11_spill] sm:$0xff] %v4421_v1 }
  0x16   :  { %3672 = vmatpush3.bf16.msra.mxu0 %v3877_v15 }
  0x17   :  { %3673 = vmatprep.subr.bf16.mxu0 %v5619_v0  ;;  %3692 = vmatpush3.bf16.msra.mxu1 %v3878_v13 }
  0x18   :  { %3693 = vmatprep.subr.bf16.mxu1 %v3880_v16 }
  0x1a   :  { %3674 = vmatpush3.bf16.msra.mxu0 %v3879_v17 }
  0x1b   :  { %3675 = vmatprep.subr.bf16.mxu0 %v5619_v0  ;;  %3694 = vmatpush3.bf16.msra.mxu1 %v3880_v16 }
  0x1c   :  { %3695 = vmatprep.subr.bf16.mxu1 %v3882_v19 }
  0x1e   :  { %3676 = vmatpush3.bf16.msra.mxu0 %v3881_v18 }
  0x1f   :  { %3696 = vmatpush3.bf16.msra.mxu1 %v3882_v19 }
  0x20   :  { %3777 = vmatprep.subr.bf16.mxu1 %v5619_v0 }
  0x21   :  { %3678 = vmatmul.mubr.bf16.vlgmr.msra.gmra.mrb[0].mxu0 %v4307_v26 }
  0x22   :  { %3745 = vmatprep.mubr.bf16.mxu0 %v69_v14  ;;  %3698 = vmatmul.mubr.bf16.vlgmr.msra.gmra.mrb[0].mxu1 %v4309_v27 }
  0x23   :  { %3701 = vmatprep.mubr.bf16.mxu1 %v4311_v28 }
  0x2a   :  { %3702 = vmatmul.mubr.bf16.gmra.mrb[4].mxu1 %v4329_v33 }
  0x2b   :  { %3705 = vmatprep.mubr.bf16.mxu1 %v4331_v34 }
  0x32   :  { %3706 = vmatmul.mubr.bf16.gmra.mrb[8].mxu1 %v4347_v39 }
  0x33   :  { %3709 = vmatprep.mubr.bf16.mxu1 %v4349_v40 }
  0x3a   :  { %3710 = vmatmul.mubr.bf16.gmra.mrb[12].mxu1 %v4365_v45 }
  0x3b   :  { %3713 = vmatprep.mubr.bf16.mxu1 %v4367_v46 }
  0x42   :  { %3714 = vmatmul.mubr.bf16.gmra.mrb[16].mxu1 %v4383_v51 }
  0x43   :  { %3717 = vmatprep.mubr.bf16.mxu1 %v4385_v52 }
  0x4a   :  { %3718 = vmatmul.mubr.bf16.gmra.mrb[20].mxu1 %v4401_v57 }
  0x4b   :  { %3721 = vmatprep.mubr.bf16.mxu1 %v4403_v58 }
  0x52   :  { %3722 = vmatmul.mubr.bf16.gmra.mrb[24].mxu1 %v4419_v63 }
  0x53   :  { %3725 = vmatprep.mubr.bf16.mxu1 %v4421_v1 }
  0x54   :  { %16 = vsyncpa [#allocation5], 0  ;;  %v4431_v4 = vpack.c.bf16 %v67_v3, %v66_v2  ;;  %v4169_v5 = vmov 1966171168   ;;  %v435_v7 = vlaneseq  ;;  %v3395_v10 = vld [vmem:[%s5616_s7] ss:$0 sm:$0xff] }
  0x55   :  { %v433_v6 = vunpack.c.l.s4 %v4169_v5  ;;  %v4449_v20 = vld [vmem:[%s5616_s7 + $0x1] ss:$0 sm:$0xff]  ;;  %vm780_vm1 = vcmask 130112   ;;  %vm917_vm2 = vcmask 1041409   ;;  %vm919_vm3 = vcmask 1042434  }
  0x56   :  { %5639 = vst [vmem:[#allocation12_spill] sm:$0xff] %v4431_v4  ;;  %v4437_v9 = vshrl.u32 %v435_v7, 7  ;;  %vm921_vm4 = vcmask 1043459   ;;  %vm923_vm5 = vcmask 1044484   ;;  %vm925_vm6 = vcmask 1045509  }
  0x57   :  { %v434_v8 = vunpack.c.0.s8 %v433_v6  ;;  %vm927_vm7 = vcmask 1046534   ;;  %vm929_vm8 = vcmask 1047559   ;;  %vm940_vm9 = vcmask 130048  }
  0x58   :  { %v4452_v22 = vsub.s32 0, %v4437_v9 }
  0x59   :  { %v4443_v11 = vsub.s32 %v434_v8, %v4437_v9 }
  0x5a   :  { %3726 = vmatmul.mubr.bf16.gmra.mrb[28].mxu1 %v4431_v4 }
  0x5b   :  { %3793 = vmatprep.mubr.msk.bf16.mxu1 %vm4168_vm0, %v5619_v0 }
  0xf4   :  { %v190_v12 = vpop.f32.mrb[0].mxu0 }
  0xf5   :  { %v191_v13 = vadd.f32 %v3395_v10, %v190_v12  ;;  %v3679_v14 = vpop.f32.mrb[1].mxu0  ;;  %v3699_v16 = vpop.f32.mrb[0].mxu1 }
  0xf6   :  { %v193_v15 = vpop.f32.mrb[2].mxu0  ;;  %v302_v21 = vpop.f32.mrb[1].mxu1  ;;  %v311_v38 = vadd.f32 %v3699_v16, %v4449_v20 }
  0xf7   :  { %v431_v17 = vcombine.high %v191_v13, %v191_v13  ;;  %v438_v18 = vrot.slane %v191_v13, %v4443_v11  ;;  %v3680_v19 = vpop.f32.mrb[3].mxu0  ;;  %v3700_v23 = vpop.f32.mrb[2].mxu1  ;;  %v303_v29 = vadd.f32 %v4449_v20, %v302_v21 }
  0xf8   :  { %v305_v25 = vpop.f32.mrb[3].mxu1  ;;  %v314_v41 = vadd.f32 %v3700_v23, %v4449_v20 }
  0xf9   :  { %v446_v24 = vcombine.high %v438_v18, %v438_v18  ;;  %v306_v30 = vadd.f32 %v4449_v20, %v305_v25  ;;  %v454_v31 = vrot.slane %v438_v18, %v4443_v11  ;;  %v445_v32 = vrot.slane %v431_v17, %v4443_v11 }
  0xfa   :  { %v194_v17 = vadd.f32 %v3395_v10, %v193_v15 }
  0xfb   :  { %v532_v35 = vrot.slane %v454_v31, %v4452_v22  ;;  %v468_v36 = vrot.slane %v446_v24, %v4443_v11  ;;  %v476_v37 = vcombine.high %v454_v31, %v454_v31  ;;  %v447_v48 = vcombine.high %v445_v32, %v445_v32 }
  0xfc   :  { %v461_v14 = vrot.slane %v445_v32, %v4443_v11  ;;  %v487_v10 = vrot.slane %v194_v17, %v4443_v11 }
  0xfd   :  { %v3703_v42 = vpop.f32.mrb[4].mxu1  ;;  %v609_v43 = vmul.f32 %v532_v35, %v303_v29  ;;  %v536_v44 = vrot.slane %v468_v36, %v4452_v22  ;;  %v610_v47 = vmul.f32 %v532_v35, %v306_v30  ;;  %v478_v53 = vcombine.high %v468_v36, %v468_v36 }
  0xfe   :  { %v327_v49 = vadd.f32 %v3703_v42, %v4449_v20  ;;  %v318_v50 = vpop.f32.mrb[5].mxu1  ;;  %v540_v60 = vrot.slane %v476_v37, %v4452_v22  ;;  %v475_v12 = vrot.slane %v447_v48, %v4443_v11  ;;  %v548_v25 = vrot.slane %v461_v14, %v4452_v22 }
  0xff   :  { %v319_v54 = vadd.f32 %v4449_v20, %v318_v50  ;;  %v3704_v55 = vpop.f32.mrb[6].mxu1  ;;  %641 = vadd.xlane.f32.xlu0 %v609_v43  ;;  %v611_v56 = vmul.f32 %v536_v44, %v311_v38  ;;  %v612_v59 = vmul.f32 %v536_v44, %v314_v41  ;;  %v544_v2 = vrot.slane %v478_v53, %v4452_v22 }
 0x100   :  { %v330_v61 = vadd.f32 %v3704_v55, %v4449_v20  ;;  %v321_v62 = vpop.f32.mrb[7].mxu1  ;;  %v552_v21 = vrot.slane %v475_v12, %v4452_v22  ;;  %v479_v36 = vcombine.high %v475_v12, %v475_v12  ;;  %v477_v38 = vcombine.high %v461_v14, %v461_v14 }
 0x101   :  { %v322_v3 = vadd.f32 %v4449_v20, %v321_v62  ;;  %645 = vadd.xlane.f32.xlu1 %v611_v56  ;;  %v613_v5 = vmul.f32 %v540_v60, %v319_v54  ;;  %v615_v8 = vmul.f32 %v544_v2, %v327_v49  ;;  %v495_v42 = vcombine.high %v487_v10, %v487_v10 }
 0x102   :  { %v616_v6 = vmul.f32 %v544_v2, %v330_v61  ;;  %v556_v50 = vrot.slane %v477_v38, %v4452_v22  ;;  %v503_v62 = vrot.slane %v487_v10, %v4443_v11 }
 0x103   :  { %643 = vadd.xlane.f32.xlu0 %v610_v47  ;;  %v614_v13 = vmul.f32 %v540_v60, %v322_v3  ;;  %v560_v47 = vrot.slane %v479_v36, %v4452_v22  ;;  %v517_v61 = vrot.slane %v495_v42, %v4443_v11 }
 0x105   :  { %v3707_v16 = vpop.f32.mrb[8].mxu1  ;;  %647 = vadd.xlane.f32.xlu1 %v612_v59  ;;  %v568_v12 = vrot.slane %v517_v61, %v4452_v22 }
 0x106   :  { %v343_v18 = vadd.f32 %v3707_v16, %v4449_v20  ;;  %v334_v19 = vpop.f32.mrb[9].mxu1  ;;  %v564_v16 = vrot.slane %v503_v62, %v4452_v22 }
 0x107   :  { %v335_v23 = vadd.f32 %v4449_v20, %v334_v19  ;;  %v3708_v24 = vpop.f32.mrb[10].mxu1  ;;  %649 = vadd.xlane.f32.xlu0 %v613_v5  ;;  %v480_v5 = vcombine.high %v194_v17, %v194_v17 }
 0x108   :  { %v346_v29 = vadd.f32 %v3708_v24, %v4449_v20  ;;  %v337_v30 = vpop.f32.mrb[11].mxu1  ;;  %v619_v31 = vmul.f32 %v552_v21, %v343_v18 }
 0x109   :  { %v338_v32 = vadd.f32 %v4449_v20, %v337_v30  ;;  %655 = vadd.xlane.f32.xlu1 %v616_v6  ;;  %v617_v35 = vmul.f32 %v548_v25, %v335_v23  ;;  %v494_v17 = vrot.slane %v480_v5, %v4443_v11 }
 0x10a   :  { %v620_v15 = vmul.f32 %v552_v21, %v346_v29  ;;  %v527_v29 = vcombine.high %v517_v61, %v517_v61 }
 0x10b   :  { %653 = vadd.xlane.f32.xlu0 %v615_v8  ;;  %v618_v37 = vmul.f32 %v548_v25, %v338_v32 }
 0x10c   :  { %v576_v36 = vrot.slane %v527_v29, %v4452_v22 }
 0x10d   :  { %v3711_v41 = vpop.f32.mrb[12].mxu1  ;;  %651 = vadd.xlane.f32.xlu1 %v614_v13 }
 0x10e   :  { %v359_v43 = vadd.f32 %v3711_v41, %v4449_v20  ;;  %v350_v44 = vpop.f32.mrb[13].mxu1 }
 0x10f   :  { %v351_v48 = vadd.f32 %v4449_v20, %v350_v44  ;;  %v3712_v49 = vpop.f32.mrb[14].mxu1  ;;  %661 = vadd.xlane.f32.xlu0 %v619_v31  ;;  %v525_v31 = vcombine.high %v503_v62, %v503_v62 }
 0x110   :  { %v362_v53 = vadd.f32 %v3712_v49, %v4449_v20  ;;  %v353_v54 = vpop.f32.mrb[15].mxu1  ;;  %v623_v55 = vmul.f32 %v560_v47, %v359_v43 }
 0x111   :  { %v354_v56 = vadd.f32 %v4449_v20, %v353_v54  ;;  %663 = vadd.xlane.f32.xlu1 %v620_v15  ;;  %v621_v59 = vmul.f32 %v556_v50, %v351_v48  ;;  %v572_v41 = vrot.slane %v525_v31, %v4452_v22  ;;  %v510_v54 = vrot.slane %v494_v17, %v4443_v11 }
 0x112   :  { %v624_v60 = vmul.f32 %v560_v47, %v362_v53 }
 0x113   :  { %657 = vadd.xlane.f32.xlu0 %v617_v35  ;;  %v622_v2 = vmul.f32 %v556_v50, %v354_v56  ;;  %v496_v35 = vcombine.high %v494_v17, %v494_v17 }
 0x115   :  { %v3715_v3 = vpop.f32.mrb[16].mxu1  ;;  %659 = vadd.xlane.f32.xlu1 %v618_v37  ;;  %v524_v50 = vrot.slane %v496_v35, %v4443_v11 }
 0x116   :  { %v375_v6 = vadd.f32 %v3715_v3, %v4449_v20  ;;  %v366_v8 = vpop.f32.mrb[17].mxu1 }
 0x117   :  { %v367_v13 = vadd.f32 %v4449_v20, %v366_v8  ;;  %v3716_v14 = vpop.f32.mrb[18].mxu1  ;;  %669 = vadd.xlane.f32.xlu0 %v623_v55 }
 0x118   :  { %v378_v18 = vadd.f32 %v3716_v14, %v4449_v20  ;;  %v369_v19 = vpop.f32.mrb[19].mxu1  ;;  %v627_v21 = vmul.f32 %v568_v12, %v375_v6 }
 0x119   :  { %v370_v23 = vadd.f32 %v4449_v20, %v369_v19  ;;  %671 = vadd.xlane.f32.xlu1 %v624_v60  ;;  %v625_v24 = vmul.f32 %v564_v16, %v367_v13  ;;  %v584_v60 = vrot.slane %v524_v50, %v4452_v22  ;;  %v528_v13 = vcombine.high %v524_v50, %v524_v50 }
 0x11a   :  { %v628_v25 = vmul.f32 %v568_v12, %v378_v18 }
 0x11b   :  { %665 = vadd.xlane.f32.xlu0 %v621_v59  ;;  %v626_v30 = vmul.f32 %v564_v16, %v370_v23  ;;  %v526_v16 = vcombine.high %v510_v54, %v510_v54  ;;  %v592_v23 = vrot.slane %v528_v13, %v4452_v22 }
 0x11d   :  { %v3719_v32 = vpop.f32.mrb[20].mxu1  ;;  %667 = vadd.xlane.f32.xlu1 %v622_v2  ;;  %v580_v2 = vrot.slane %v510_v54, %v4452_v22 }
 0x11e   :  { %v391_v10 = vadd.f32 %v3719_v32, %v4449_v20  ;;  %v382_v15 = vpop.f32.mrb[21].mxu1 }
 0x11f   :  { %v383_v37 = vadd.f32 %v4449_v20, %v382_v15  ;;  %v3720_v38 = vpop.f32.mrb[22].mxu1  ;;  %677 = vadd.xlane.f32.xlu0 %v627_v21 }
 0x120   :  { %v394_v42 = vadd.f32 %v3720_v38, %v4449_v20  ;;  %v385_v43 = vpop.f32.mrb[23].mxu1  ;;  %v631_v44 = vmul.f32 %v576_v36, %v391_v10 }
 0x121   :  { %v386_v47 = vadd.f32 %v4449_v20, %v385_v43  ;;  %679 = vadd.xlane.f32.xlu1 %v628_v25  ;;  %v629_v48 = vmul.f32 %v572_v41, %v383_v37  ;;  %v588_v25 = vrot.slane %v526_v16, %v4452_v22 }
 0x122   :  { %v632_v49 = vmul.f32 %v576_v36, %v394_v42 }
 0x123   :  { %673 = vadd.xlane.f32.xlu0 %v625_v24  ;;  %v630_v53 = vmul.f32 %v572_v41, %v386_v47 }
 0x125   :  { %v3723_v55 = vpop.f32.mrb[24].mxu1  ;;  %675 = vadd.xlane.f32.xlu1 %v626_v30 }
 0x126   :  { %v407_v56 = vadd.f32 %v3723_v55, %v4449_v20  ;;  %v398_v59 = vpop.f32.mrb[25].mxu1 }
 0x127   :  { %v399_v61 = vadd.f32 %v4449_v20, %v398_v59  ;;  %v3724_v62 = vpop.f32.mrb[26].mxu1  ;;  %685 = vadd.xlane.f32.xlu0 %v631_v44  ;;  %v770_v44 = vand.u32 127, %v435_v7 }
 0x128   :  { %v410_v3 = vadd.f32 %v3724_v62, %v4449_v20  ;;  %v401_v5 = vpop.f32.mrb[27].mxu1  ;;  %v635_v6 = vmul.f32 %v584_v60, %v407_v56 }
 0x129   :  { %v402_v8 = vadd.f32 %v4449_v20, %v401_v5  ;;  %687 = vadd.xlane.f32.xlu1 %v632_v49  ;;  %v633_v11 = vmul.f32 %v580_v2, %v399_v61  ;;  %v4528_v7 = vsub.s32 %v770_v44, %v4437_v9 }
 0x12a   :  { %v636_v12 = vmul.f32 %v584_v60, %v410_v3 }
 0x12b   :  { %681 = vadd.xlane.f32.xlu0 %v629_v48  ;;  %v634_v14 = vmul.f32 %v580_v2, %v402_v8  ;;  %5641 = vst [vmem:[#allocation14_spill] sm:$0xff] %v4528_v7 }
 0x12d   :  { %v3727_v18 = vpop.f32.mrb[28].mxu1  ;;  %683 = vadd.xlane.f32.xlu1 %v630_v53 }
 0x12e   :  { %v423_v19 = vadd.f32 %v3727_v18, %v4449_v20  ;;  %v414_v21 = vpop.f32.mrb[29].mxu1 }
 0x12f   :  { %v415_v24 = vadd.f32 %v4449_v20, %v414_v21  ;;  %v3728_v17 = vpop.f32.mrb[30].mxu1  ;;  %693 = vadd.xlane.f32.xlu0 %v635_v6 }
 0x130   :  { %v426_v29 = vadd.f32 %v3728_v17, %v4449_v20  ;;  %v417_v30 = vpop.f32.mrb[31].mxu1  ;;  %v639_v31 = vmul.f32 %v592_v23, %v423_v19 }
 0x131   :  { %v418_v32 = vadd.f32 %v4449_v20, %v417_v30  ;;  %695 = vadd.xlane.f32.xlu1 %v636_v12  ;;  %v637_v35 = vmul.f32 %v588_v25, %v415_v24  ;;  %v775_v20 = vadd.s32 4294967288, %v770_v44 }
 0x132   :  { %v640_v10 = vmul.f32 %v592_v23, %v426_v29 }
 0x133   :  { %689 = vadd.xlane.f32.xlu0 %v633_v11  ;;  %v638_v15 = vmul.f32 %v588_v25, %v418_v32  ;;  %v4519_v54 = vsub.s32 %v775_v20, %v4437_v9 }
 0x135   :  { %691 = vadd.xlane.f32.xlu1 %v634_v14  ;;  %5640 = vst [vmem:[#allocation13_spill] sm:$0xff] %v4519_v54 }
 0x137   :  { %697 = vadd.xlane.f32.xlu0 %v637_v35 }
 0x139   :  { %699 = vadd.xlane.f32.xlu1 %v638_v15 }
 0x13b   :  { %701 = vadd.xlane.f32.xlu0 %v639_v31 }
 0x13d   :  { %703 = vadd.xlane.f32.xlu1 %v640_v10 }
 0x18c   :  { %v642_v36 = vpop.xlane.xlu0 %641 }
 0x18d   :  { %v4530_v61 = vmul.f32 0.088388346, %v642_v36 }
 0x18e   :  { %v646_v37 = vpop.xlane.xlu1 %645 }
 0x18f   :  { %v4521_v55 = vmul.f32 0.088388346, %v646_v37  ;;  %v774_v16 = vrot.slane %v4530_v61, %v4528_v7 }
 0x190   :  { %v644_v38 = vpop.xlane.xlu0 %643 }
 0x191   :  { %v4523_v56 = vmul.f32 0.088388346, %v644_v38  ;;  %v785_v5 = vrot.slane %v4521_v55, %v4528_v7 }
 0x192   :  { %v648_v41 = vpop.xlane.xlu1 %647 }
 0x193   :  { %v4514_v49 = vmul.f32 0.088388346, %v648_v41  ;;  %v779_v6 = vrot.slane %v4523_v56, %v4519_v54 }
 0x194   :  { %v650_v42 = vpop.xlane.xlu0 %649 }
 0x195   :  { %v4525_v60 = vmul.f32 0.088388346, %v650_v42  ;;  %v789_v62 = vrot.slane %v4514_v49, %v4519_v54  ;;  %v781_v17 = vsel %vm780_vm1, %v779_v6, %v774_v16 }
 0x196   :  { %v656_v43 = vpop.xlane.xlu1 %655 }
 0x197   :  { %v794_v12 = vrot.slane %v4525_v60, %v4528_v7  ;;  %v790_v18 = vsel %vm780_vm1, %v789_v62, %v785_v5  ;;  %v4551_v19 = vmul.f32 0.088388346, %v656_v43 }
 0x198   :  { %v654_v47 = vpop.xlane.xlu0 %653  ;;  %v918_v31 = vsel %vm917_vm2, %v790_v18, %v781_v17 }
 0x199   :  { %v4540_v8 = vmul.f32 0.088388346, %v654_v47  ;;  %v807_v35 = vrot.slane %v4551_v19, %v4519_v54 }
 0x19a   :  { %v652_v48 = vpop.xlane.xlu1 %651 }
 0x19b   :  { %v4516_v53 = vmul.f32 0.088388346, %v652_v48  ;;  %v803_v25 = vrot.slane %v4540_v8, %v4528_v7 }
 0x19c   :  { %v662_v50 = vpop.xlane.xlu0 %661 }
 0x19d   :  { %v798_v3 = vrot.slane %v4516_v53, %v4519_v54  ;;  %v4567_v15 = vmul.f32 0.088388346, %v662_v50  ;;  %v808_v42 = vsel %vm780_vm1, %v807_v35, %v803_v25 }
 0x19e   :  { %v664_v59 = vpop.xlane.xlu1 %663 }
 0x19f   :  { %v799_v23 = vsel %vm780_vm1, %v798_v3, %v794_v12  ;;  %v4559_v29 = vmul.f32 0.088388346, %v664_v59  ;;  %v821_v50 = vrot.slane %v4567_v15, %v4528_v7 }
 0x1a0   :  { %v658_v2 = vpop.xlane.xlu0 %657  ;;  %v920_v10 = vsel %vm919_vm3, %v799_v23, %v918_v31 }
 0x1a1   :  { %v4544_v13 = vmul.f32 0.088388346, %v658_v2  ;;  %v825_v43 = vrot.slane %v4559_v29, %v4519_v54  ;;  %v922_v48 = vsel %vm921_vm4, %v808_v42, %v920_v10 }
 0x1a2   :  { %v660_v11 = vpop.xlane.xlu1 %659 }
 0x1a3   :  { %v4546_v14 = vmul.f32 0.088388346, %v660_v11  ;;  %v812_v32 = vrot.slane %v4544_v13, %v4528_v7  ;;  %v826_v12 = vsel %vm780_vm1, %v825_v43, %v821_v50 }
 0x1a4   :  { %v670_v21 = vpop.xlane.xlu0 %669 }
 0x1a5   :  { %v816_v24 = vrot.slane %v4546_v14, %v4519_v54  ;;  %v4577_v44 = vmul.f32 0.088388346, %v670_v21 }
 0x1a6   :  { %v672_v30 = vpop.xlane.xlu1 %671 }
 0x1a7   :  { %v4569_v36 = vmul.f32 0.088388346, %v672_v30  ;;  %v817_v38 = vsel %vm780_vm1, %v816_v24, %v812_v32  ;;  %v839_v6 = vrot.slane %v4577_v44, %v4528_v7 }
 0x1a8   :  { %v666_v37 = vpop.xlane.xlu0 %665  ;;  %v924_v2 = vsel %vm923_vm5, %v817_v38, %v922_v48 }
 0x1a9   :  { %v4572_v41 = vmul.f32 0.088388346, %v666_v37  ;;  %v843_v59 = vrot.slane %v4569_v36, %v4519_v54  ;;  %v926_v18 = vsel %vm925_vm6, %v826_v12, %v924_v2 }
 0x1aa   :  { %v668_v47 = vpop.xlane.xlu1 %667 }
 0x1ab   :  { %v4579_v20 = vmul.f32 0.088388346, %v668_v47  ;;  %v830_v3 = vrot.slane %v4572_v41, %v4528_v7  ;;  %v844_v23 = vsel %vm780_vm1, %v843_v59, %v839_v6 }
 0x1ac   :  { %v678_v62 = vpop.xlane.xlu0 %677 }
 0x1ad   :  { %v834_v5 = vrot.slane %v4579_v20, %v4519_v54  ;;  %v4610_v59 = vmul.f32 0.088388346, %v678_v62 }
 0x1ae   :  { %v680_v11 = vpop.xlane.xlu1 %679 }
 0x1af   :  { %v835_v16 = vsel %vm780_vm1, %v834_v5, %v830_v3  ;;  %v4604_v43 = vmul.f32 0.088388346, %v680_v11 }
 0x1b0   :  { %v674_v21 = vpop.xlane.xlu0 %673  ;;  %v928_v24 = vsel %vm927_vm7, %v835_v16, %v926_v18 }
 0x1b1   :  { %v930_v17 = vsel %vm929_vm8, %v844_v23, %v928_v24  ;;  %v4606_v47 = vmul.f32 0.088388346, %v674_v21  ;;  %v861_v6 = vrot.slane %v4604_v43, %v4519_v54  ;;  %v857_v21 = vrot.slane %v4610_v59, %v4528_v7 }
 0x1b2   :  { %v676_v25 = vpop.xlane.xlu1 %675  ;;  %v941_v30 = vsel %vm940_vm9, %v930_v17, -inf }
 0x1b3   :  { %942 = vmax.xlane.f32.xlu0 %v941_v30  ;;  %v4600_v37 = vmul.f32 0.088388346, %v676_v25  ;;  %v848_v11 = vrot.slane %v4606_v47, %v4528_v7 }
 0x1b4   :  { %v686_v31 = vpop.xlane.xlu0 %685 }
 0x1b5   :  { %v852_v2 = vrot.slane %v4600_v37, %v4519_v54  ;;  %v4629_v24 = vmul.f32 0.088388346, %v686_v31 }
 0x1b6   :  { %v688_v32 = vpop.xlane.xlu1 %687 }
 0x1b7   :  { %v4620_v12 = vmul.f32 0.088388346, %v688_v32  ;;  %v853_v23 = vsel %vm780_vm1, %v852_v2, %v848_v11  ;;  %v862_v32 = vsel %vm780_vm1, %v861_v6, %v857_v21 }
 0x1b8   :  { %v682_v35 = vpop.xlane.xlu0 %681  ;;  %v931_v0 = vsel %vm917_vm2, %v862_v32, %v853_v23 }
 0x1b9   :  { %v4608_v48 = vmul.f32 0.088388346, %v682_v35  ;;  %v879_v35 = vrot.slane %v4620_v12, %v4519_v54 }
 0x1ba   :  { %v684_v10 = vpop.xlane.xlu1 %683 }
 0x1bb   :  { %v4602_v38 = vmul.f32 0.088388346, %v684_v10  ;;  %v866_v16 = vrot.slane %v4608_v48, %v4528_v7 }
 0x1bc   :  { %v694_v42 = vpop.xlane.xlu0 %693 }
 0x1bd   :  { %v870_v3 = vrot.slane %v4602_v38, %v4519_v54 }
 0x1be   :  { %v696_v50 = vpop.xlane.xlu1 %695 }
 0x1bf   :  { %v871_v25 = vsel %vm780_vm1, %v870_v3, %v866_v16  ;;  %v4637_v10 = vmul.f32 0.088388346, %v696_v50  ;;  %v875_v3 = vrot.slane %v4629_v24, %v4528_v7  ;;  %v4649_v16 = vmul.f32 0.088388346, %v694_v42 }
 0x1c0   :  { %v690_v5 = vpop.xlane.xlu0 %689  ;;  %v932_v6 = vsel %vm919_vm3, %v871_v25, %v931_v0 }
 0x1c1   :  { %v4624_v62 = vmul.f32 0.088388346, %v690_v5  ;;  %v880_v23 = vsel %vm780_vm1, %v879_v35, %v875_v3  ;;  %v897_v32 = vrot.slane %v4637_v10, %v4519_v54 }
 0x1c2   :  { %v692_v18 = vpop.xlane.xlu1 %691  ;;  %v933_v25 = vsel %vm921_vm4, %v880_v23, %v932_v6 }
 0x1c3   :  { %v4631_v17 = vmul.f32 0.088388346, %v692_v18  ;;  %v884_v31 = vrot.slane %v4624_v62, %v4528_v7 }
 0x1c4   :  { %v698_v30 = vpop.xlane.xlu0 %697 }
 0x1c5   :  { %v888_v5 = vrot.slane %v4631_v17, %v4519_v54  ;;  %v4644_v2 = vmul.f32 0.088388346, %v698_v30 }
 0x1c6   :  { %v700_v11 = vpop.xlane.xlu1 %699 }
 0x1c7   :  { %v4651_v50 = vmul.f32 0.088388346, %v700_v11  ;;  %v889_v18 = vsel %vm780_vm1, %v888_v5, %v884_v31  ;;  %v902_v0 = vrot.slane %v4644_v2, %v4528_v7  ;;  %v893_v5 = vrot.slane %v4649_v16, %v4528_v7 }
 0x1c8   :  { %v702_v21 = vpop.xlane.xlu0 %701  ;;  %v934_v35 = vsel %vm923_vm5, %v889_v18, %v933_v25 }
 0x1c9   :  { %v906_v30 = vrot.slane %v4651_v50, %v4519_v54  ;;  %v4659_v26 = vmul.f32 0.088388346, %v702_v21  ;;  %v898_v3 = vsel %vm780_vm1, %v897_v32, %v893_v5  ;;  %v4683_v32 = vsub.s32 1, %v4437_v9 }
 0x1ca   :  { %v704_v42 = vpop.xlane.xlu1 %703  ;;  %v935_v1 = vsel %vm925_vm6, %v898_v3, %v934_v35  ;;  %v4691_v5 = vsub.s32 3, %v4437_v9 }
 0x1cb   :  { %v4666_v31 = vmul.f32 0.088388346, %v704_v42  ;;  %v907_v11 = vsel %vm780_vm1, %v906_v30, %v902_v0  ;;  %v911_v21 = vrot.slane %v4659_v26, %v4528_v7  ;;  %v5624_v30 = vmov 0  }
 0x1cc   :  { %v936_v23 = vsel %vm927_vm7, %v907_v11, %v935_v1  ;;  %3866 = vset.pattern.permute.xlu1 %v5624_v30  ;;  %3865 = vset.pattern.permute.xlu0 %v5624_v30  ;;  %v4686_v0 = vsub.s32 2, %v4437_v9 }
 0x1cd   :  { %v915_v4 = vrot.slane %v4666_v31, %v4519_v54 }
 0x1cf   :  { %v916_v6 = vsel %vm780_vm1, %v915_v4, %v911_v21 }
 0x1d0   :  { %v937_v42 = vsel %vm929_vm8, %v916_v6, %v936_v23  ;;  %v4698_v6 = vsub.s32 4, %v4437_v9 }
 0x1d1   :  { %v944_v18 = vsel %vm940_vm9, %v937_v42, -inf }
 0x1d2   :  { %945 = vmax.xlane.f32.xlu1 %v944_v18 }
 0x240   :  { %v943_v25 = vpop.xlane.xlu0 %942 }
 0x241   :  { %v952_v4 = vrot.slane %v943_v25, %v4452_v22  ;;  %v956_v1 = vrot.slane %v943_v25, %v4683_v32  ;;  %v960_v35 = vrot.slane %v943_v25, %v4686_v0  ;;  %v964_v23 = vrot.slane %v943_v25, %v4691_v5 }
 0x242   :  { %v968_v54 = vrot.slane %v943_v25, %v4698_v6 }
 0x243   :  { %v1029_v11 = vsub.f32 %v4530_v61, %v952_v4  ;;  %v1030_v3 = vsub.f32 %v4523_v56, %v952_v4  ;;  %v1031_v21 = vsub.f32 %v4521_v55, %v956_v1  ;;  %v1034_v42 = vsub.f32 %v4516_v53, %v960_v35 }
 0x244   :  { %v1032_v63 = vsub.f32 %v4514_v49, %v956_v1  ;;  %v1036_v61 = vsub.f32 %v4551_v19, %v964_v23  ;;  %v4706_v55 = vsub.s32 5, %v4437_v9  ;;  %v1033_v4 = vsub.f32 %v4525_v60, %v960_v35 }
 0x245   :  { %v1061_v18 = vmul.f32 1.442695, %v1029_v11  ;;  %v1063_v30 = vmul.f32 1.442695, %v1030_v3  ;;  %v1065_v7 = vmul.f32 1.442695, %v1031_v21  ;;  %v1038_v53 = vsub.f32 %v4546_v14, %v968_v54 }
 0x246   :  { %v1071_v56 = vmul.f32 1.442695, %v1034_v42  ;;  %v1067_v58 = vmul.f32 1.442695, %v1032_v63  ;;  %v1075_v11 = vmul.f32 1.442695, %v1036_v61  ;;  %v972_v1 = vrot.slane %v943_v25, %v4706_v55 }
 0x247   :  { %4003 = vpow2.f32 %v1061_v18  ;;  %v4711_v49 = vsub.s32 6, %v4437_v9  ;;  %v1069_v19 = vmul.f32 1.442695, %v1033_v4  ;;  %v1079_v3 = vmul.f32 1.442695, %v1038_v53 }
 0x248   :  { %4005 = vpow2.f32 %v1063_v30  ;;  %v1035_v30 = vsub.f32 %v4540_v8, %v964_v23  ;;  %v4718_v60 = vsub.s32 7, %v4437_v9 }
 0x249   :  { %4007 = vpow2.f32 %v1065_v7  ;;  %v976_v63 = vrot.slane %v943_v25, %v4711_v49  ;;  %v1040_v7 = vsub.f32 %v4559_v29, %v972_v1  ;;  %v1039_v29 = vsub.f32 %v4567_v15, %v972_v1 }
 0x24a   :  { %4009 = vpow2.f32 %v1071_v56  ;;  %v1073_v8 = vmul.f32 1.442695, %v1035_v30  ;;  %v980_v9 = vrot.slane %v943_v25, %v4718_v60 }
 0x24b   :  { %4011 = vpow2.f32 %v1067_v58  ;;  %v1037_v58 = vsub.f32 %v4544_v13, %v968_v54  ;;  %v1042_v23 = vsub.f32 %v4579_v20, %v976_v63  ;;  %v1083_v42 = vmul.f32 1.442695, %v1040_v7 }
 0x24c   :  { %4013 = vpow2.f32 %v1075_v11  ;;  %v1044_v13 = vsub.f32 %v4569_v36, %v980_v9  ;;  %v1041_v20 = vsub.f32 %v4572_v41, %v976_v63  ;;  %v1081_v4 = vmul.f32 1.442695, %v1039_v29 }
 0x24d   :  { %4015 = vpow2.f32 %v1069_v19  ;;  %v1077_v61 = vmul.f32 1.442695, %v1037_v58  ;;  %v1087_v56 = vmul.f32 1.442695, %v1042_v23  ;;  %v1043_v19 = vsub.f32 %v4577_v44, %v980_v9 }
 0x24e   :  { %4017 = vpow2.f32 %v1079_v3  ;;  %v1091_v15 = vmul.f32 1.442695, %v1044_v13  ;;  %v1085_v41 = vmul.f32 1.442695, %v1041_v20 }
 0x24f   :  { %4019 = vpow2.f32 %v1073_v8  ;;  %v1089_v8 = vmul.f32 1.442695, %v1043_v19 }
 0x250   :  { %4021 = vpow2.f32 %v1083_v42 }
 0x251   :  { %v4715_v21 = vpop.eup %4003  ;;  %4023 = vpow2.f32 %v1077_v61 }
 0x252   :  { %v4722_v14 = vpop.eup %4005  ;;  %1158 = vperm.xlu0 %3865, %v4715_v21   ;;  %4025 = vpow2.f32 %v1087_v56 }
 0x253   :  { %1161 = vperm.xlu1 %3866, %v4722_v14   ;;  %v4727_v35 = vpop.eup %4007  ;;  %4027 = vpow2.f32 %v1081_v4 }
 0x254   :  { %v4731_v18 = vpop.eup %4009  ;;  %4029 = vpow2.f32 %v1091_v15 }
 0x255   :  { %v4736_v54 = vpop.eup %4011  ;;  %4031 = vpow2.f32 %v1085_v41 }
 0x256   :  { %1173 = vperm.xlu0 %3865, %v4731_v18   ;;  %v4739_v25 = vpop.eup %4013  ;;  %4033 = vpow2.f32 %v1089_v8 }
 0x257   :  { %1164 = vperm.xlu1 %3866, %v4727_v35   ;;  %v4744_v53 = vpop.eup %4015 }
 0x258   :  { %v4746_v1 = vpop.eup %4017 }
 0x259   :  { %v4755_v3 = vpop.eup %4019 }
 0x25a   :  { %1179 = vperm.xlu0 %3865, %v4739_v25   ;;  %v4757_v63 = vpop.eup %4021 }
 0x25b   :  { %1167 = vperm.xlu1 %3866, %v4736_v54   ;;  %v4767_v9 = vpop.eup %4023 }
 0x25c   :  { %v4769_v23 = vpop.eup %4025 }
 0x25d   :  { %v4780_v56 = vpop.eup %4027 }
 0x25e   :  { %1185 = vperm.xlu0 %3865, %v4746_v1   ;;  %v4782_v20 = vpop.eup %4029 }
 0x25f   :  { %v946_v11 = vpop.xlane.xlu1 %945  ;;  %1170 = vperm.xlu1 %3866, %v4744_v53   ;;  %v4790_v41 = vpop.eup %4031 }
 0x260   :  { %v4751_v36 = vrot.slane %v946_v11, %v4686_v0  ;;  %v984_v30 = vrot.slane %v946_v11, %v4452_v22  ;;  %v4760_v7 = vrot.slane %v946_v11, %v4691_v5  ;;  %v4772_v42 = vrot.slane %v946_v11, %v4698_v6 }
 0x261   :  { %v1004_v4 = vrot.slane %v946_v11, %v4706_v55 }
 0x262   :  { %v1050_v58 = vsub.f32 %v4602_v38, %v4751_v36  ;;  %v1045_v44 = vsub.f32 %v4606_v47, %v984_v30  ;;  %1191 = vperm.xlu0 %3865, %v4757_v63   ;;  %v1052_v29 = vsub.f32 %v4620_v12, %v4760_v7  ;;  %v988_v38 = vrot.slane %v946_v11, %v4683_v32 }
 0x263   :  { %1176 = vperm.xlu1 %3866, %v4755_v3   ;;  %v1046_v47 = vsub.f32 %v4600_v37, %v984_v30  ;;  %v1054_v12 = vsub.f32 %v4631_v17, %v4772_v42  ;;  %v1008_v30 = vrot.slane %v946_v11, %v4711_v49 }
 0x264   :  { %v1103_v61 = vmul.f32 1.442695, %v1050_v58  ;;  %v1093_v13 = vmul.f32 1.442695, %v1045_v44  ;;  %v1107_v15 = vmul.f32 1.442695, %v1052_v29  ;;  %v1047_v19 = vsub.f32 %v4610_v59, %v988_v38  ;;  %v4796_v29 = vpop.eup %4033 }
 0x265   :  { %v1095_v37 = vmul.f32 1.442695, %v1046_v47  ;;  %v1056_v58 = vsub.f32 %v4637_v10, %v1004_v4  ;;  %v1111_v8 = vmul.f32 1.442695, %v1054_v12  ;;  %v1048_v17 = vsub.f32 %v4604_v43, %v988_v38 }
 0x266   :  { %1197 = vperm.xlu0 %3865, %v4769_v23   ;;  %4035 = vpow2.f32 %v1103_v61  ;;  %v1097_v44 = vmul.f32 1.442695, %v1047_v19  ;;  %v1012_v59 = vrot.slane %v946_v11, %v4718_v60  ;;  %v1058_v61 = vsub.f32 %v4651_v50, %v1008_v30 }
 0x267   :  { %1182 = vperm.xlu1 %3866, %v4767_v9   ;;  %4037 = vpow2.f32 %v1093_v13  ;;  %v1115_v47 = vmul.f32 1.442695, %v1056_v58  ;;  %v1049_v10 = vsub.f32 %v4608_v48, %v4751_v36  ;;  %v1099_v13 = vmul.f32 1.442695, %v1048_v17 }
 0x268   :  { %4039 = vpow2.f32 %v1107_v15  ;;  %v1060_v38 = vsub.f32 %v4666_v31, %v1012_v59  ;;  %v1119_v11 = vmul.f32 1.442695, %v1058_v61  ;;  %v1051_v50 = vsub.f32 %v4629_v24, %v4760_v7 }
 0x269   :  { %4041 = vpow2.f32 %v1095_v37  ;;  %v1101_v15 = vmul.f32 1.442695, %v1049_v10  ;;  %v1053_v31 = vsub.f32 %v4624_v62, %v4772_v42  ;;  %v1055_v7 = vsub.f32 %v4649_v16, %v1004_v4 }
 0x26a   :  { %1203 = vperm.xlu0 %3865, %v4782_v20   ;;  %4043 = vpow2.f32 %v1111_v8  ;;  %v1123_v19 = vmul.f32 1.442695, %v1060_v38  ;;  %v1105_v37 = vmul.f32 1.442695, %v1051_v50  ;;  %v1057_v62 = vsub.f32 %v4644_v2, %v1008_v30  ;;  %v3884_v50 = vld [vmem:[%s5611_s2 + $0x20] ss:$12 sps:$4 sm:$0xff]  }
 0x26b   :  { %1188 = vperm.xlu1 %3866, %v4780_v56   ;;  %4045 = vpow2.f32 %v1097_v44  ;;  %v1109_v8 = vmul.f32 1.442695, %v1053_v31  ;;  %v1113_v42 = vmul.f32 1.442695, %v1055_v7  ;;  %v1059_v16 = vsub.f32 %v4659_v26, %v1012_v59  ;;  %v3887_v31 = vld [vmem:[%s5611_s2 + $0x68] ss:$12 sps:$4 sm:$0xff]  }
 0x26c   :  { %4047 = vpow2.f32 %v1115_v47  ;;  %v1117_v4 = vmul.f32 1.442695, %v1057_v62  ;;  %v3889_v7 = vld [vmem:[%s5611_s2 + $0x98] ss:$12 sps:$4 sm:$0xff]   ;;  %v5645_v62 = vmov 0.0  }
 0x26d   :  { %4049 = vpow2.f32 %v1099_v13  ;;  %v1121_v2 = vmul.f32 1.442695, %v1059_v16 }
 0x26e   :  { %4051 = vpow2.f32 %v1119_v11  ;;  %v3883_v11 = vld [vmem:[%s5611_s2 + $0x8] ss:$12 sps:$4 sm:$0xff]  }
 0x26f   :  { %1194 = vperm.xlu1 %3866, %v4790_v41   ;;  %4053 = vpow2.f32 %v1101_v15  ;;  %3729 = vmatprep.subr.bf16.mxu0 %v3883_v11  ;;  %v3885_v15 = vld [vmem:[%s5611_s2 + $0x38] ss:$12 sps:$4 sm:$0xff]  }
 0x270   :  { %v4803_v12 = vpop.eup %4035  ;;  %4055 = vpow2.f32 %v1123_v19  ;;  %3730 = vmatpush3.bf16.msra.mxu0 %v3883_v11  ;;  %v3886_v19 = vld [vmem:[%s5611_s2 + $0x50] ss:$12 sps:$4 sm:$0xff]  }
 0x271   :  { %v4805_v43 = vpop.eup %4037  ;;  %1221 = vperm.xlu0 %3865, %v4803_v12   ;;  %4057 = vpow2.f32 %v1105_v37  ;;  %3731 = vmatprep.subr.bf16.mxu0 %v3884_v50  ;;  %v3888_v37 = vld [vmem:[%s5611_s2 + $0x80] ss:$12 sps:$4 sm:$0xff]  }
 0x272   :  { %v4812_v48 = vpop.eup %4039  ;;  %4059 = vpow2.f32 %v1109_v8  ;;  %v3890_v8 = vld [vmem:[%s5611_s2 + $0xb0] ss:$12 sps:$4 sm:$0xff]  }
 0x273   :  { %1200 = vperm.xlu1 %3866, %v4796_v29   ;;  %v4814_v36 = vpop.eup %4041  ;;  %4061 = vpow2.f32 %v1113_v42 }
 0x274   :  { %v4820_v58 = vpop.eup %4043  ;;  %4063 = vpow2.f32 %v1117_v4  ;;  %3732 = vmatpush3.bf16.msra.mxu0 %v3884_v50  ;;  %v5646_v50 = vld [vmem:[#allocation9_spill] sm:$0xff] }
 0x275   :  { %1227 = vperm.xlu0 %3865, %v4812_v48   ;;  %v4822_v24 = vpop.eup %4045  ;;  %4065 = vpow2.f32 %v1121_v2  ;;  %3733 = vmatprep.subr.bf16.mxu0 %v3885_v15 }
 0x276   :  { %v4827_v17 = vpop.eup %4047 }
 0x277   :  { %1206 = vperm.xlu1 %3866, %v4805_v43   ;;  %v4829_v44 = vpop.eup %4049 }
 0x278   :  { %v4834_v61 = vpop.eup %4051  ;;  %3734 = vmatpush3.bf16.msra.mxu0 %v3885_v15 }
 0x279   :  { %1233 = vperm.xlu0 %3865, %v4820_v58   ;;  %v4836_v47 = vpop.eup %4053  ;;  %3735 = vmatprep.subr.bf16.mxu0 %v3886_v19 }
 0x27a   :  { %v4841_v10 = vpop.eup %4055 }
 0x27b   :  { %1209 = vperm.xlu1 %3866, %v4814_v36   ;;  %5642 = vst [vmem:[#allocation15_spill] sm:$0xff] %v4841_v10  ;;  %v4843_v13 = vpop.eup %4057 }
 0x27c   :  { %v4847_v30 = vpop.eup %4059  ;;  %3736 = vmatpush3.bf16.msra.mxu0 %v3886_v19  ;;  %v5648_v19 = vld [vmem:[#allocation14_spill] sm:$0xff] }
 0x27d   :  { %1239 = vperm.xlu0 %3865, %v4827_v17   ;;  %v4850_v38 = vpop.eup %4061  ;;  %3737 = vmatprep.subr.bf16.mxu0 %v3887_v31 }
 0x27e   :  { %v4853_v26 = vpop.eup %4063 }
 0x27f   :  { %1212 = vperm.xlu1 %3866, %v4822_v24   ;;  %5643 = vst [vmem:[#allocation16_spill] sm:$0xff] %v4853_v26  ;;  %v4856_v59 = vpop.eup %4065 }
 0x280   :  { %5644 = vst [vmem:[#allocation17_spill] sm:$0xff] %v4856_v59  ;;  %3738 = vmatpush3.bf16.msra.mxu0 %v3887_v31 }
 0x281   :  { %1245 = vperm.xlu0 %3865, %v4834_v61   ;;  %3739 = vmatprep.subr.bf16.mxu0 %v3888_v37 }
 0x283   :  { %1215 = vperm.xlu1 %3866, %v4829_v44  }
 0x284   :  { %3740 = vmatpush3.bf16.msra.mxu0 %v3888_v37 }
 0x285   :  { %1251 = vperm.xlu0 %3865, %v4841_v10   ;;  %3741 = vmatprep.subr.bf16.mxu0 %v3889_v7  ;;  %v5649_v10 = vld [vmem:[#allocation10_spill] sm:$0xff] }
 0x287   :  { %1218 = vperm.xlu1 %3866, %v4836_v47  }
 0x288   :  { %3742 = vmatpush3.bf16.msra.mxu0 %v3889_v7 }
 0x289   :  { %3743 = vmatprep.subr.bf16.mxu0 %v3890_v8 }
 0x28b   :  { %1224 = vperm.xlu1 %3866, %v4843_v13  }
 0x28c   :  { %3744 = vmatpush3.bf16.msra.mxu0 %v3890_v8 }
 0x28d   :  { %3797 = vmatprep.subr.bf16.mxu0 %v5645_v62 }
 0x28f   :  { %1230 = vperm.xlu1 %3866, %v4847_v30   ;;  %3746 = vmatmul.mubr.bf16.vlgmr.msra.gmra.mrb[4].mxu0 %v4309_v27 }
 0x290   :  { %3749 = vmatprep.mubr.bf16.mxu0 %v4311_v28 }
 0x293   :  { %1236 = vperm.xlu1 %3866, %v4850_v38  }
 0x297   :  { %1242 = vperm.xlu1 %3866, %v4853_v26   ;;  %3750 = vmatmul.mubr.bf16.gmra.mrb[8].mxu0 %v4329_v33 }
 0x298   :  { %3753 = vmatprep.mubr.bf16.mxu0 %v4331_v34 }
 0x29b   :  { %1248 = vperm.xlu1 %3866, %v4856_v59  }
 0x29f   :  { %3754 = vmatmul.mubr.bf16.gmra.mrb[12].mxu0 %v4347_v39 }
 0x2a0   :  { %3757 = vmatprep.mubr.bf16.mxu0 %v4349_v40 }
 0x2a7   :  { %3758 = vmatmul.mubr.bf16.gmra.mrb[16].mxu0 %v4365_v45  ;;  %v5647_v45 = vld [vmem:[#allocation13_spill] sm:$0xff] }
 0x2a8   :  { %3761 = vmatprep.mubr.bf16.mxu0 %v4367_v46 }
 0x2af   :  { %3762 = vmatmul.mubr.bf16.gmra.mrb[20].mxu0 %v4383_v51 }
 0x2b0   :  { %3765 = vmatprep.mubr.bf16.mxu0 %v4385_v52 }
 0x2b7   :  { %3766 = vmatmul.mubr.bf16.gmra.mrb[24].mxu0 %v4401_v57 }
 0x2b8   :  { %3769 = vmatprep.mubr.bf16.mxu0 %v5646_v50 }
 0x2bf   :  { %3770 = vmatmul.mubr.bf16.gmra.mrb[28].mxu0 %v5649_v10 }
 0x2d1   :  { %v1159_v42 = vpop.permute.xlu0 %1158 }
 0x2d2   :  { %v1162_v16 = vpop.permute.xlu1 %1161  ;;  %v1256_v51 = vrot.slane %v1159_v42, %v5648_v19 }
 0x2d3   :  { %v1260_v7 = vrot.slane %v1162_v16, %v5647_v45 }
 0x2d5   :  { %v1174_v2 = vpop.permute.xlu0 %1173 }
 0x2d6   :  { %v1165_v4 = vpop.permute.xlu1 %1164  ;;  %v1278_v59 = vrot.slane %v1174_v2, %v5647_v45 }
 0x2d7   :  { %v1265_v8 = vrot.slane %v1165_v4, %v5648_v19  ;;  %v5650_v4 = vld [vmem:[#allocation11_spill] sm:$0xff] }
 0x2d8   :  { %3773 = vmatprep.mubr.bf16.mxu0 %v5650_v4 }
 0x2d9   :  { %v1180_v27 = vpop.permute.xlu0 %1179 }
 0x2da   :  { %v1168_v11 = vpop.permute.xlu1 %1167 }
 0x2db   :  { %v1269_v15 = vrot.slane %v1168_v11, %v5647_v45  ;;  %v1287_v11 = vrot.slane %v1180_v27, %v5647_v45 }
 0x2dd   :  { %v1186_v33 = vpop.permute.xlu0 %1185  ;;  %v1270_v50 = vsel %vm780_vm1, %v1269_v15, %v1265_v8 }
 0x2de   :  { %v1171_v28 = vpop.permute.xlu1 %1170  ;;  %v1296_v42 = vrot.slane %v1186_v33, %v5647_v45 }
 0x2df   :  { %v1274_v31 = vrot.slane %v1171_v28, %v5648_v19 }
 0x2e1   :  { %v1192_v39 = vpop.permute.xlu0 %1191  ;;  %v1279_v16 = vsel %vm780_vm1, %v1278_v59, %v1274_v31 }
 0x2e2   :  { %v1177_v34 = vpop.permute.xlu1 %1176 }
 0x2e3   :  { %v1283_v52 = vrot.slane %v1177_v34, %v5648_v19  ;;  %v1261_v34 = vsel %vm780_vm1, %v1260_v7, %v1256_v51 }
 0x2e4   :  { %v1397_v27 = vsel %vm917_vm2, %v1270_v50, %v1261_v34 }
 0x2e5   :  { %v1198_v46 = vpop.permute.xlu0 %1197  ;;  %v1288_v2 = vsel %vm780_vm1, %v1287_v11, %v1283_v52  ;;  %v1398_v33 = vsel %vm919_vm3, %v1279_v16, %v1397_v27  ;;  %v5651_v11 = vld [vmem:[#allocation12_spill] sm:$0xff] }
 0x2e6   :  { %v1183_v40 = vpop.permute.xlu1 %1182  ;;  %v1314_v10 = vrot.slane %v1198_v46, %v5647_v45  ;;  %v1399_v8 = vsel %vm921_vm4, %v1288_v2, %v1398_v33  ;;  %3774 = vmatmul.mubr.bf16.gmra.mrb[32].mxu0 %v5651_v11 }
 0x2e7   :  { %v1292_v57 = vrot.slane %v1183_v40, %v5648_v19  ;;  %v1305_v40 = vrot.slane %v1192_v39, %v5647_v45  ;;  %3813 = vmatprep.mubr.msk.bf16.mxu0 %vm4168_vm0, %v5645_v62 }
 0x2e9   :  { %v1204_v59 = vpop.permute.xlu0 %1203 }
 0x2ea   :  { %v1189_v37 = vpop.permute.xlu1 %1188 }
 0x2eb   :  { %v1301_v28 = vrot.slane %v1189_v37, %v5648_v19  ;;  %v1297_v37 = vsel %vm780_vm1, %v1296_v42, %v1292_v57 }
 0x2ec   :  { %v1400_v39 = vsel %vm923_vm5, %v1297_v37, %v1399_v8 }
 0x2ed   :  { %v1306_v31 = vsel %vm780_vm1, %v1305_v40, %v1301_v28 }
 0x2ee   :  { %v1195_v26 = vpop.permute.xlu1 %1194  ;;  %v1401_v57 = vsel %vm925_vm6, %v1306_v31, %v1400_v39 }
 0x2ef   :  { %v1310_v15 = vrot.slane %v1195_v26, %v5648_v19  ;;  %v1323_v26 = vrot.slane %v1204_v59, %v5647_v45 }
 0x2f0   :  { %v1222_v4 = vpop.permute.xlu0 %1221 }
 0x2f1   :  { %v1315_v7 = vsel %vm780_vm1, %v1314_v10, %v1310_v15 }
 0x2f2   :  { %v1201_v51 = vpop.permute.xlu1 %1200  ;;  %v1402_v50 = vsel %vm927_vm7, %v1315_v7, %v1401_v57  ;;  %v1350_v57 = vrot.slane %v1222_v4, %v5647_v45 }
 0x2f3   :  { %v1319_v52 = vrot.slane %v1201_v51, %v5648_v19 }
 0x2f4   :  { %v1228_v40 = vpop.permute.xlu0 %1227 }
 0x2f5   :  { %v1324_v46 = vsel %vm780_vm1, %v1323_v26, %v1319_v52 }
 0x2f6   :  { %v1207_v28 = vpop.permute.xlu1 %1206  ;;  %v1403_v16 = vsel %vm929_vm8, %v1324_v46, %v1402_v50  ;;  %v1359_v50 = vrot.slane %v1228_v40, %v5647_v45 }
 0x2f7   :  { %v1413_v42 = vsel %vm940_vm9, %v1403_v16, 0.0  ;;  %v1328_v11 = vrot.slane %v1207_v28, %v5648_v19 }
 0x2f8   :  { %1414 = vadd.xlane.f32.xlu1 %v1413_v42  ;;  %v1234_v27 = vpop.permute.xlu0 %1233 }
 0x2fa   :  { %v1210_v34 = vpop.permute.xlu1 %1209 }
 0x2fb   :  { %v1332_v39 = vrot.slane %v1210_v34, %v5647_v45 }
 0x2fc   :  { %v1240_v59 = vpop.permute.xlu0 %1239 }
 0x2fe   :  { %v1213_v2 = vpop.permute.xlu1 %1212 }
 0x2ff   :  { %v1337_v26 = vrot.slane %v1213_v2, %v5648_v19  ;;  %v1333_v2 = vsel %vm780_vm1, %v1332_v39, %v1328_v11 }
 0x300   :  { %v1246_v8 = vpop.permute.xlu0 %1245 }
 0x301   :  { %v1386_v40 = vrot.slane %v1246_v8, %v5647_v45 }
 0x302   :  { %v1216_v15 = vpop.permute.xlu1 %1215 }
 0x303   :  { %v1341_v31 = vrot.slane %v1216_v15, %v5647_v45  ;;  %v1368_v15 = vrot.slane %v1234_v27, %v5647_v45 }
 0x305   :  { %v1342_v16 = vsel %vm780_vm1, %v1341_v31, %v1337_v26  ;;  %v1252_v31 = vpop.permute.xlu0 %1251 }
 0x306   :  { %v1219_v37 = vpop.permute.xlu1 %1218  ;;  %v1404_v28 = vsel %vm917_vm2, %v1342_v16, %v1333_v2 }
 0x307   :  { %v1346_v7 = vrot.slane %v1219_v37, %v5648_v19 }
 0x309   :  { %v1351_v34 = vsel %vm780_vm1, %v1350_v57, %v1346_v7 }
 0x30a   :  { %v1225_v10 = vpop.permute.xlu1 %1224  ;;  %v1405_v27 = vsel %vm919_vm3, %v1351_v34, %v1404_v28 }
 0x30b   :  { %v1355_v52 = vrot.slane %v1225_v10, %v5648_v19  ;;  %v1377_v10 = vrot.slane %v1240_v59, %v5647_v45 }
 0x30d   :  { %v1360_v4 = vsel %vm780_vm1, %v1359_v50, %v1355_v52  ;;  %v1395_v52 = vrot.slane %v1252_v31, %v5647_v45 }
 0x30e   :  { %v1231_v33 = vpop.permute.xlu1 %1230  ;;  %v1406_v26 = vsel %vm921_vm4, %v1360_v4, %v1405_v27 }
 0x30f   :  { %v1364_v46 = vrot.slane %v1231_v33, %v5648_v19 }
 0x312   :  { %v1237_v51 = vpop.permute.xlu1 %1236 }
 0x313   :  { %v1373_v42 = vrot.slane %v1237_v51, %v5648_v19  ;;  %v1369_v51 = vsel %vm780_vm1, %v1368_v15, %v1364_v46 }
 0x314   :  { %v1407_v57 = vsel %vm923_vm5, %v1369_v51, %v1406_v26 }
 0x315   :  { %v1378_v7 = vsel %vm780_vm1, %v1377_v10, %v1373_v42 }
 0x316   :  { %v1243_v37 = vpop.permute.xlu1 %1242  ;;  %v1408_v50 = vsel %vm925_vm6, %v1378_v7, %v1407_v57 }
 0x317   :  { %v1382_v33 = vrot.slane %v1243_v37, %v5648_v19 }
 0x319   :  { %v1387_v39 = vsel %vm780_vm1, %v1386_v40, %v1382_v33 }
 0x31a   :  { %v1249_v59 = vpop.permute.xlu1 %1248  ;;  %v1409_v46 = vsel %vm927_vm7, %v1387_v39, %v1408_v50 }
 0x31b   :  { %v1391_v8 = vrot.slane %v1249_v59, %v5648_v19 }
 0x31d   :  { %v1396_v11 = vsel %vm780_vm1, %v1395_v52, %v1391_v8 }
 0x31e   :  { %v1410_v16 = vsel %vm929_vm8, %v1396_v11, %v1409_v46 }
 0x31f   :  { %v1416_v42 = vsel %vm940_vm9, %v1410_v16, 0.0 }
 0x320   :  { %1417 = vadd.xlane.f32.xlu0 %v1416_v42 }
 0x362   :  { %v4969_v2 = vpop.f32.mrb[4].mxu0 }
 0x363   :  { %v4971_v10 = vpop.f32.mrb[5].mxu0 }
 0x364   :  { %v4974_v40 = vpop.f32.mrb[6].mxu0 }
 0x365   :  { %v4978_v51 = vpop.f32.mrb[7].mxu0 }
 0x385   :  { %v1415_v15 = vpop.xlane.xlu1 %1414 }
 0x386   :  { %v1424_v34 = vrot.slane %v1415_v15, %v4452_v22  ;;  %v1428_v45 = vrot.slane %v1415_v15, %v4683_v32  ;;  %v1432_v19 = vrot.slane %v1415_v15, %v4686_v0  ;;  %v1436_v37 = vrot.slane %v1415_v15, %v4691_v5 }
 0x387   :  { %v1440_v33 = vrot.slane %v1415_v15, %v4698_v6  ;;  %v1444_v7 = vrot.slane %v1415_v15, %v4706_v55  ;;  %v1452_v8 = vrot.slane %v1415_v15, %v4718_v60 }
 0x388   :  { %4067 = vrcp.f32 %v1424_v34 }
 0x389   :  { %4069 = vrcp.f32 %v1428_v45 }
 0x38a   :  { %4071 = vrcp.f32 %v1432_v19 }
 0x38b   :  { %4073 = vrcp.f32 %v1436_v37 }
 0x38c   :  { %4075 = vrcp.f32 %v1440_v33 }
 0x38d   :  { %4077 = vrcp.f32 %v1444_v7 }
 0x392   :  { %v4068_v4 = vpop.eup %4067 }
 0x393   :  { %v1503_v28 = vmul.f32 %v4068_v4, %v4722_v14  ;;  %v1502_v31 = vmul.f32 %v4068_v4, %v4715_v21  ;;  %v4070_v27 = vpop.eup %4069  ;;  %v1448_v14 = vrot.slane %v1415_v15, %v4711_v49 }
 0x394   :  { %v1505_v26 = vmul.f32 %v4070_v27, %v4727_v35  ;;  %v1506_v39 = vmul.f32 %v4070_v27, %v4736_v54  ;;  %v4072_v59 = vpop.eup %4071 }
 0x395   :  { %1788 = vperm.xlu1 %3866, %v1503_v28   ;;  %1783 = vperm.xlu0 %3865, %v1502_v31   ;;  %v1508_v21 = vmul.f32 %v4072_v59, %v4744_v53  ;;  %v1509_v52 = vmul.f32 %v4072_v59, %v4731_v18  ;;  %v4074_v57 = vpop.eup %4073  ;;  %4079 = vrcp.f32 %v1448_v14  ;;  %v4991_v18 = vpop.f32.mrb[8].mxu0 }
 0x396   :  { %v1511_v35 = vmul.f32 %v4074_v57, %v4755_v3  ;;  %v1512_v54 = vmul.f32 %v4074_v57, %v4739_v25  ;;  %v4076_v50 = vpop.eup %4075  ;;  %4081 = vrcp.f32 %v1452_v8  ;;  %v4993_v16 = vpop.f32.mrb[9].mxu0 }
 0x397   :  { %v1514_v11 = vmul.f32 %v4076_v50, %v4767_v9  ;;  %v1515_v53 = vmul.f32 %v4076_v50, %v4746_v1  ;;  %v4078_v46 = vpop.eup %4077  ;;  %v4997_v25 = vpop.f32.mrb[10].mxu0 }
 0x398   :  { %v1517_v42 = vmul.f32 %v4078_v46, %v4780_v56  ;;  %v1518_v3 = vmul.f32 %v4078_v46, %v4757_v63  ;;  %v4999_v34 = vpop.f32.mrb[11].mxu0 }
 0x399   :  { %1793 = vperm.xlu1 %3866, %v1505_v26   ;;  %1798 = vperm.xlu0 %3865, %v1506_v39   ;;  %v5005_v37 = vpop.f32.mrb[12].mxu0 }
 0x39a   :  { %v5011_v4 = vpop.f32.mrb[13].mxu0 }
 0x39d   :  { %1803 = vperm.xlu1 %3866, %v1508_v21   ;;  %1808 = vperm.xlu0 %3865, %v1509_v52  }
 0x39f   :  { %v4080_v15 = vpop.eup %4079 }
 0x3a0   :  { %v1520_v1 = vmul.f32 %v4080_v15, %v4790_v41  ;;  %v1521_v9 = vmul.f32 %v4080_v15, %v4769_v23  ;;  %v4082_v45 = vpop.eup %4081  ;;  %v5015_v23 = vpop.f32.mrb[14].mxu0 }
 0x3a1   :  { %1813 = vperm.xlu1 %3866, %v1511_v35   ;;  %1818 = vperm.xlu0 %3865, %v1512_v54   ;;  %v1523_v33 = vmul.f32 %v4082_v45, %v4796_v29  ;;  %v1524_v41 = vmul.f32 %v4082_v45, %v4782_v20  ;;  %v5017_v28 = vpop.f32.mrb[15].mxu0 }
 0x3a2   :  { %v5021_v27 = vpop.f32.mrb[16].mxu0 }
 0x3a3   :  { %v5025_v29 = vpop.f32.mrb[17].mxu0 }
 0x3a4   :  { %v5027_v20 = vpop.f32.mrb[18].mxu0 }
 0x3a5   :  { %1823 = vperm.xlu1 %3866, %v1514_v11   ;;  %1828 = vperm.xlu0 %3865, %v1515_v53   ;;  %v5029_v26 = vpop.f32.mrb[19].mxu0  ;;  %v3894_v53 = vld [vmem:[%s5612_s3 + $0x8] sm:$0xff]  }
 0x3a9   :  { %1833 = vperm.xlu1 %3866, %v1517_v42   ;;  %1838 = vperm.xlu0 %3865, %v1518_v3  }
 0x3ad   :  { %1843 = vperm.xlu1 %3866, %v1520_v1   ;;  %1848 = vperm.xlu0 %3865, %v1521_v9   ;;  %v5003_v19 = vpop.xlane.xlu0 %1417 }
 0x3ae   :  { %v1456_v63 = vrot.slane %v5003_v19, %v4452_v22  ;;  %v1460_v56 = vrot.slane %v5003_v19, %v4683_v32  ;;  %v1464_v31 = vrot.slane %v5003_v19, %v4686_v0  ;;  %v1468_v7 = vrot.slane %v5003_v19, %v4691_v5 }
 0x3af   :  { %v1472_v59 = vrot.slane %v5003_v19, %v4698_v6  ;;  %v1476_v57 = vrot.slane %v5003_v19, %v4706_v55  ;;  %v1480_v6 = vrot.slane %v5003_v19, %v4711_v49  ;;  %v3893_v49 = vld [vmem:[%s5612_s3 + $0x48] sm:$0xff]  }
 0x3b0   :  { %4083 = vrcp.f32 %v1456_v63  ;;  %v3895_v63 = vld [vmem:[%s5612_s3 + $0x50] sm:$0xff]  }
 0x3b1   :  { %1853 = vperm.xlu1 %3866, %v1523_v33   ;;  %1858 = vperm.xlu0 %3865, %v1524_v41   ;;  %4085 = vrcp.f32 %v1460_v56 }
 0x3b2   :  { %4087 = vrcp.f32 %v1464_v31 }
 0x3b3   :  { %4089 = vrcp.f32 %v1468_v7 }
 0x3b4   :  { %4091 = vrcp.f32 %v1472_v59  ;;  %v5653_v59 = vld [vmem:[#allocation15_spill] sm:$0xff] }
 0x3b5   :  { %4093 = vrcp.f32 %v1476_v57 }
 0x3b6   :  { %4095 = vrcp.f32 %v1480_v6 }
 0x3ba   :  { %v4084_v39 = vpop.eup %4083 }
 0x3bb   :  { %v1527_v14 = vmul.f32 %v4084_v39, %v4814_v36  ;;  %v1526_v21 = vmul.f32 %v4084_v39, %v4805_v43  ;;  %v4086_v52 = vpop.eup %4085  ;;  %v3891_v43 = vld [vmem:[%s5612_s3 + $0x40] sm:$0xff]  }
 0x3bc   :  { %v1530_v8 = vmul.f32 %v4086_v52, %v4829_v44  ;;  %v1529_v35 = vmul.f32 %v4086_v52, %v4822_v24  ;;  %v4088_v54 = vpop.eup %4087  ;;  %v3892_v36 = vld [vmem:[%s5612_s3] sm:$0xff]   ;;  %v5049_v24 = vpop.f32.mrb[20].mxu0  ;;  %3778 = vmatpush3.bf16.msra.mxu1 %v3891_v43 }
 0x3bd   :  { %1868 = vperm.xlu0 %3865, %v1527_v14   ;;  %1863 = vperm.xlu1 %3866, %v1526_v21   ;;  %v1533_v55 = vmul.f32 %v4088_v54, %v4803_v12  ;;  %v1532_v44 = vmul.f32 %v4088_v54, %v4836_v47  ;;  %v4090_v50 = vpop.eup %4089  ;;  %v5051_v11 = vpop.f32.mrb[21].mxu0  ;;  %v1484_v47 = vrot.slane %v5003_v19, %v4718_v60  ;;  %v5654_v21 = vld [vmem:[#allocation17_spill] sm:$0xff] }
 0x3be   :  { %3798 = vmatpush3.bf16.msra.mxu0 %v3892_v36  ;;  %v5059_v12 = vpop.f32.mrb[22].mxu0  ;;  %3779 = vmatprep.subr.bf16.mxu1 %v5645_v62  ;;  %v1536_v42 = vmul.f32 %v4090_v50, %v4812_v48  ;;  %v1535_v3 = vmul.f32 %v4090_v50, %v4843_v13  ;;  %v4092_v15 = vpop.eup %4091  ;;  %v3901_v50 = vld [vmem:[%s5612_s3 + $0x68] sm:$0xff]  }
 0x3bf   :  { %3799 = vmatprep.subr.bf16.mxu0 %v5645_v62  ;;  %v5065_v46 = vpop.f32.mrb[23].mxu0  ;;  %4097 = vrcp.f32 %v1484_v47  ;;  %v1539_v60 = vmul.f32 %v4092_v15, %v4820_v58  ;;  %v1538_v1 = vmul.f32 %v4092_v15, %v4847_v30  ;;  %v4094_v9 = vpop.eup %4093  ;;  %v3896_v58 = vld [vmem:[%s5612_s3 + $0x10] sm:$0xff]  }
 0x3c0   :  { %3780 = vmatpush3.bf16.msra.mxu1 %v3893_v49  ;;  %v5073_v48 = vpop.f32.mrb[24].mxu0  ;;  %v1542_v45 = vmul.f32 %v4094_v9, %v4827_v17  ;;  %v1541_v19 = vmul.f32 %v4094_v9, %v4850_v38  ;;  %v4096_v56 = vpop.eup %4095  ;;  %v5652_v38 = vld [vmem:[#allocation16_spill] sm:$0xff]  ;;  %v3902_v49 = vld [vmem:[%s5612_s3 + $0x28] sm:$0xff]   ;;  %v3904_v47 = vld [vmem:[%s5612_s3 + $0x30] sm:$0xff]  }
 0x3c1   :  { %1878 = vperm.xlu0 %3865, %v1530_v8   ;;  %1873 = vperm.xlu1 %3866, %v1529_v35   ;;  %v5075_v13 = vpop.f32.mrb[25].mxu0  ;;  %v1545_v17 = vmul.f32 %v4096_v56, %v4834_v61  ;;  %v1544_v41 = vmul.f32 %v4096_v56, %v5652_v38  ;;  %v3897_v8 = vld [vmem:[%s5612_s3 + $0x58] sm:$0xff]   ;;  %v3909_v15 = vld [vmem:[%s5613_s4 + $0x4] ss:$16 sps:$4 sm:$0xff]  }
 0x3c2   :  { %3800 = vmatpush3.bf16.msra.mxu0 %v3894_v53  ;;  %3781 = vmatprep.subr.bf16.mxu1 %v5645_v62  ;;  %v5085_v30 = vpop.f32.mrb[26].mxu0  ;;  %v3898_v35 = vld [vmem:[%s5612_s3 + $0x18] sm:$0xff]   ;;  %v3903_v53 = vld [vmem:[%s5612_s3 + $0x70] sm:$0xff]  }
 0x3c3   :  { %3801 = vmatprep.subr.bf16.mxu0 %v5645_v62  ;;  %v5087_v33 = vpop.f32.mrb[27].mxu0  ;;  %v3918_v9 = vld [vmem:[%s5613_s4 + $0x2c] ss:$16 sps:$4 sm:$0xff]   ;;  %v3922_v56 = vld [vmem:[%s5613_s4 + $0x48] ss:$16 sps:$4 sm:$0xff]  }
 0x3c4   :  { %3782 = vmatpush3.bf16.msra.mxu1 %v3895_v63  ;;  %v5093_v7 = vpop.f32.mrb[28].mxu0  ;;  %v5656_v63 = vmov 0   ;;  %v3928_v38 = vld [vmem:[%s5613_s4 + $0x68] ss:$16 sps:$4 sm:$0xff]  }
 0x3c5   :  { %1888 = vperm.xlu0 %3865, %v1533_v55   ;;  %1883 = vperm.xlu1 %3866, %v1532_v44   ;;  %v5095_v39 = vpop.f32.mrb[29].mxu0  ;;  %v3899_v55 = vld [vmem:[%s5612_s3 + $0x60] sm:$0xff]  }
 0x3c6   :  { %3802 = vmatpush3.bf16.msra.mxu0 %v3896_v58  ;;  %3783 = vmatprep.subr.bf16.mxu1 %v5645_v62  ;;  %v5099_v57 = vpop.f32.mrb[30].mxu0  ;;  %v3900_v44 = vld [vmem:[%s5612_s3 + $0x20] sm:$0xff]   ;;  %v3924_v58 = vld [vmem:[%s5613_s4 + $0x4c] ss:$16 sps:$4 sm:$0xff]  }
 0x3c7   :  { %3803 = vmatprep.subr.bf16.mxu0 %v5645_v62  ;;  %v5101_v61 = vpop.f32.mrb[31].mxu0 }
 0x3c8   :  { %3784 = vmatpush3.bf16.msra.mxu1 %v3897_v8  ;;  %v5111_v54 = vpop.f32.mrb[32].mxu0 }
 0x3c9   :  { %1898 = vperm.xlu0 %3865, %v1536_v42   ;;  %1893 = vperm.xlu1 %3866, %v1535_v3   ;;  %v4098_v31 = vpop.eup %4097  ;;  %v5113_v6 = vpop.f32.mrb[33].mxu0  ;;  %v3905_v42 = vld [vmem:[%s5612_s3 + $0x78] sm:$0xff]  }
 0x3ca   :  { %v1548_v14 = vmul.f32 %v4098_v31, %v5653_v59  ;;  %v1547_v52 = vmul.f32 %v4098_v31, %v5654_v21  ;;  %3804 = vmatpush3.bf16.msra.mxu0 %v3898_v35  ;;  %3785 = vmatprep.subr.bf16.mxu1 %v5645_v62  ;;  %v5115_v43 = vpop.f32.mrb[34].mxu0  ;;  %v3906_v3 = vld [vmem:[%s5612_s3 + $0x38] sm:$0xff]   ;;  %v5187_v59 = vld [vmem:[%s5616_s7 + $0x2] ss:$0 sm:$0xff] }
 0x3cb   :  { %3805 = vmatprep.subr.bf16.mxu0 %v5645_v62  ;;  %v5117_v36 = vpop.f32.mrb[35].mxu0  ;;  %v3934_v31 = vld [vmem:[%s5613_s4 + $0x88] ss:$16 sps:$4 sm:$0xff]   ;;  %v1658_v21 = vadd.f32 %v5187_v59, %v4978_v51  ;;  %v1663_v35 = vadd.f32 %v4969_v2, %v5187_v59  ;;  %v1674_v51 = vadd.f32 %v5187_v59, %v4999_v34  ;;  %v1679_v2 = vadd.f32 %v4991_v18, %v5187_v59 }
 0x3cc   :  { %3786 = vmatpush3.bf16.msra.mxu1 %v3899_v55  ;;  %v1666_v55 = vadd.f32 %v4974_v40, %v5187_v59  ;;  %v1687_v34 = vadd.f32 %v5187_v59, %v5011_v4  ;;  %v1698_v4 = vadd.f32 %v5015_v23, %v5187_v59  ;;  %v1706_v23 = vadd.f32 %v5187_v59, %v5029_v26 }
 0x3cd   :  { %1908 = vperm.xlu0 %3865, %v1539_v60   ;;  %1903 = vperm.xlu1 %3866, %v1538_v1   ;;  %v3912_v60 = vld [vmem:[%s5613_s4 + $0xc] ss:$16 sps:$4 sm:$0xff]   ;;  %v3910_v1 = vld [vmem:[%s5613_s4 + $0x8] ss:$16 sps:$4 sm:$0xff]  }
 0x3ce   :  { %3806 = vmatpush3.bf16.msra.mxu0 %v3900_v44  ;;  %3787 = vmatprep.subr.bf16.mxu1 %v5645_v62 }
 0x3cf   :  { %3807 = vmatprep.subr.bf16.mxu0 %v5645_v62 }
 0x3d0   :  { %3788 = vmatpush3.bf16.msra.mxu1 %v3901_v50 }
 0x3d1   :  { %1918 = vperm.xlu0 %3865, %v1542_v45   ;;  %1913 = vperm.xlu1 %3866, %v1541_v19   ;;  %v5655_v45 = vld [vmem:[#allocation8_spill] sm:$0xff]  ;;  %v3916_v19 = vld [vmem:[%s5613_s4 + $0x28] ss:$16 sps:$4 sm:$0xff]  }
 0x3d2   :  { %3808 = vmatpush3.bf16.msra.mxu0 %v3902_v49  ;;  %3789 = vmatprep.subr.bf16.mxu1 %v5645_v62 }
 0x3d3   :  { %3809 = vmatprep.subr.bf16.mxu0 %v5645_v62 }
 0x3d4   :  { %3790 = vmatpush3.bf16.msra.mxu1 %v3903_v53 }
 0x3d5   :  { %1928 = vperm.xlu0 %3865, %v1545_v17   ;;  %1923 = vperm.xlu1 %3866, %v1544_v41   ;;  %v3930_v17 = vld [vmem:[%s5613_s4 + $0x6c] ss:$16 sps:$4 sm:$0xff]  }
 0x3d6   :  { %3810 = vmatpush3.bf16.msra.mxu0 %v3904_v47  ;;  %3791 = vmatprep.subr.bf16.mxu1 %v5645_v62  ;;  %v3936_v41 = vld [vmem:[%s5613_s4 + $0x8c] ss:$16 sps:$4 sm:$0xff]  }
 0x3d7   :  { %3811 = vmatprep.subr.bf16.mxu0 %v5645_v62 }
 0x3d8   :  { %3792 = vmatpush3.bf16.msra.mxu1 %v3905_v42  ;;  %v1671_v42 = vadd.f32 %v5187_v59, %v4993_v16  ;;  %v1682_v16 = vadd.f32 %v4997_v25, %v5187_v59  ;;  %v1695_v25 = vadd.f32 %v5005_v37, %v5187_v59  ;;  %v1703_v37 = vadd.f32 %v5187_v59, %v5025_v29 }
 0x3d9   :  { %1938 = vperm.xlu0 %3865, %v1548_v14   ;;  %1933 = vperm.xlu1 %3866, %v1547_v52   ;;  %v1655_v14 = vadd.f32 %v5187_v59, %v4971_v10  ;;  %v1714_v29 = vadd.f32 %v5027_v20, %v5187_v59 }
 0x3da   :  { %3812 = vmatpush3.bf16.msra.mxu0 %v3906_v3  ;;  %2583 = vmatprep.subr.bf16.mxu1 %v3909_v15 }
 0x3db   :  { %2626 = vmatprep.subr.bf16.mxu0 %v3912_v60 }
 0x3dd   :  { %3814 = vmatmul.mubr.bf16.vlgmr.msra.gmra.mrb[36].mxu0 %v5655_v45 }
 0x3de   :  { %2627 = vmatpush1.bf16.msra.mxu0 %v3910_v1  ;;  %2658 = vmatprep.mubr.bf16.mxu0 %v5656_v63 }
 0x3df   :  { %2628 = vmatprep.subr.bf16.mxu0 %v3918_v9 }
 0x3e2   :  { %2629 = vmatpush1.bf16.msra.mxu0 %v3916_v19 }
 0x3e3   :  { %2630 = vmatprep.subr.bf16.mxu0 %v3924_v58 }
 0x3e6   :  { %2631 = vmatpush1.bf16.msra.mxu0 %v3922_v56 }
 0x3e7   :  { %2632 = vmatprep.subr.bf16.mxu0 %v3930_v17 }
 0x3ea   :  { %2633 = vmatpush1.bf16.msra.mxu0 %v3928_v38 }
 0x3eb   :  { %2634 = vmatprep.subr.bf16.mxu0 %v3936_v41 }
 0x3ee   :  { %2635 = vmatpush1.bf16.msra.mxu0 %v3934_v31 }
 0x414   :  { %v1789_v52 = vpop.permute.xlu1 %1788  ;;  %v1784_v8 = vpop.permute.xlu0 %1783 }
 0x415   :  { %v1942_v44 = vmul.f32 %v1789_v52, %v1658_v21  ;;  %v1941_v50 = vmul.f32 %v1784_v8, %v1655_v14 }
 0x417   :  { %v1973_v49 = vadd.f32 %v1942_v44, %v1941_v50 }
 0x418   :  { %v1794_v53 = vpop.permute.xlu1 %1793  ;;  %v1799_v47 = vpop.permute.xlu0 %1798 }
 0x419   :  { %v1974_v10 = vrot.slane %v1973_v49, 4  ;;  %v1943_v3 = vmul.f32 %v1794_v53, %v1663_v35  ;;  %v1944_v15 = vmul.f32 %v1799_v47, %v1666_v55  ;;  %v1690_v55 = vadd.f32 %v5187_v59, %v5017_v28 }
 0x41b   :  { %v1975_v60 = vadd.f32 %v1974_v10, %v1973_v49  ;;  %v1980_v1 = vadd.f32 %v1944_v15, %v1943_v3 }
 0x41c   :  { %v1804_v40 = vpop.permute.xlu1 %1803  ;;  %v1809_v9 = vpop.permute.xlu0 %1808 }
 0x41d   :  { %v1976_v45 = vrot.slane %v1975_v60, 2  ;;  %v1981_v19 = vrot.slane %v1980_v1, 4  ;;  %v1945_v58 = vmul.f32 %v1804_v40, %v1671_v42  ;;  %v1946_v56 = vmul.f32 %v1809_v9, %v1674_v51 }
 0x41f   :  { %v1977_v17 = vadd.f32 %v1976_v45, %v1975_v60  ;;  %v1982_v38 = vadd.f32 %v1981_v19, %v1980_v1  ;;  %v1987_v41 = vadd.f32 %v1946_v56, %v1945_v58 }
 0x420   :  { %v1814_v31 = vpop.permute.xlu1 %1813  ;;  %v1819_v14 = vpop.permute.xlu0 %1818 }
 0x421   :  { %v1978_v21 = vrot.slane %v1977_v17, 1  ;;  %v1983_v52 = vrot.slane %v1982_v38, 2  ;;  %v1988_v18 = vrot.slane %v1987_v41, 4  ;;  %v1947_v8 = vmul.f32 %v1814_v31, %v1679_v2 }
 0x422   :  { %v1948_v35 = vmul.f32 %v1819_v14, %v1682_v16 }
 0x423   :  { %v1979_v44 = vadd.f32 %v1978_v21, %v1977_v17  ;;  %v1984_v50 = vadd.f32 %v1983_v52, %v1982_v38  ;;  %v1989_v49 = vadd.f32 %v1988_v18, %v1987_v41 }
 0x424   :  { %v1994_v53 = vadd.f32 %v1948_v35, %v1947_v8  ;;  %v1824_v47 = vpop.permute.xlu1 %1823  ;;  %v1829_v42 = vpop.permute.xlu0 %1828  ;;  %v1711_v8 = vadd.f32 %v5021_v27, %v5187_v59 }
 0x425   :  { %v1985_v10 = vrot.slane %v1984_v50, 1  ;;  %v1990_v3 = vrot.slane %v1989_v49, 2  ;;  %v1949_v15 = vmul.f32 %v1824_v47, %v1687_v34  ;;  %v1950_v60 = vmul.f32 %v1829_v42, %v1690_v55 }
 0x426   :  { %v1995_v51 = vrot.slane %v1994_v53, 4  ;;  %v2101_v1 = vpack.c.bf16 %v1979_v44, %v1979_v44 }
 0x427   :  { %v1986_v2 = vadd.f32 %v1985_v10, %v1984_v50  ;;  %v1991_v28 = vadd.f32 %v1990_v3, %v1989_v49  ;;  %v2001_v9 = vadd.f32 %v1950_v60, %v1949_v15 }
 0x428   :  { %v1996_v40 = vadd.f32 %v1995_v51, %v1994_v53  ;;  %v1834_v45 = vpop.permute.xlu1 %1833  ;;  %v1839_v19 = vpop.permute.xlu0 %1838  ;;  %v2149_v31 = vunpack.c.l.b16 %v2101_v1 }
 0x429   :  { %v2102_v58 = vpack.c.bf16 %v1986_v2, %v1986_v2  ;;  %v1992_v56 = vrot.slane %v1991_v28, 1  ;;  %v1951_v16 = vmul.f32 %v1834_v45, %v1695_v25  ;;  %v1952_v17 = vmul.f32 %v1839_v19, %v1698_v4 }
 0x42a   :  { %v1997_v38 = vrot.slane %v1996_v40, 2  ;;  %v2002_v41 = vrot.slane %v2001_v9, 4 }
 0x42b   :  { %v2150_v14 = vunpack.c.l.b16 %v2102_v58  ;;  %v1993_v34 = vadd.f32 %v1992_v56, %v1991_v28  ;;  %v2008_v21 = vadd.f32 %v1952_v17, %v1951_v16 }
 0x42c   :  { %v1998_v52 = vadd.f32 %v1997_v38, %v1996_v40  ;;  %v2003_v18 = vadd.f32 %v2002_v41, %v2001_v9  ;;  %v1844_v35 = vpop.permute.xlu1 %1843  ;;  %v1849_v55 = vpop.permute.xlu0 %1848 }
 0x42d   :  { %v2165_v44 = vsel %vm917_vm2, %v2150_v14, %v2149_v31  ;;  %v2103_v50 = vpack.c.bf16 %v1993_v34, %v1993_v34  ;;  %v2009_v49 = vrot.slane %v2008_v21, 4  ;;  %v1953_v25 = vmul.f32 %v1844_v35, %v1703_v37 }
 0x42e   :  { %v1999_v26 = vrot.slane %v1998_v52, 1  ;;  %v2004_v53 = vrot.slane %v2003_v18, 2  ;;  %v1954_v47 = vmul.f32 %v1849_v55, %v1706_v23 }
 0x42f   :  { %v2151_v42 = vunpack.c.l.b16 %v2103_v50  ;;  %v2010_v10 = vadd.f32 %v2009_v49, %v2008_v21 }
 0x430   :  { %v2000_v3 = vadd.f32 %v1999_v26, %v1998_v52  ;;  %v2005_v4 = vadd.f32 %v2004_v53, %v2003_v18  ;;  %v2015_v15 = vadd.f32 %v1954_v47, %v1953_v25  ;;  %v1854_v51 = vpop.permute.xlu1 %1853  ;;  %v1859_v27 = vpop.permute.xlu0 %1858 }
 0x431   :  { %v2166_v60 = vsel %vm919_vm3, %v2151_v42, %v2165_v44  ;;  %v2011_v20 = vrot.slane %v2010_v10, 2  ;;  %v1955_v1 = vmul.f32 %v1854_v51, %v1711_v8  ;;  %v1956_v2 = vmul.f32 %v1859_v27, %v1714_v29 }
 0x432   :  { %v2104_v28 = vpack.c.bf16 %v2000_v3, %v2000_v3  ;;  %v2006_v40 = vrot.slane %v2005_v4, 1  ;;  %v2016_v9 = vrot.slane %v2015_v15, 4  ;;  %v1719_v8 = vadd.f32 %v5187_v59, %v5051_v11 }
 0x433   :  { %v2012_v45 = vadd.f32 %v2011_v20, %v2010_v10  ;;  %v2022_v19 = vadd.f32 %v1956_v2, %v1955_v1  ;;  %v1722_v29 = vadd.f32 %v5187_v59, %v5065_v46  ;;  %v1727_v11 = vadd.f32 %v5049_v24, %v5187_v59 }
 0x434   :  { %v2152_v37 = vunpack.c.l.b16 %v2104_v28  ;;  %v2007_v58 = vadd.f32 %v2006_v40, %v2005_v4  ;;  %v2017_v56 = vadd.f32 %v2016_v9, %v2015_v15  ;;  %v1730_v46 = vadd.f32 %v5059_v12, %v5187_v59 }
 0x435   :  { %v2013_v16 = vrot.slane %v2012_v45, 1  ;;  %v2023_v17 = vrot.slane %v2022_v19, 4  ;;  %v1735_v20 = vadd.f32 %v5187_v59, %v5075_v13  ;;  %v1738_v1 = vadd.f32 %v5187_v59, %v5087_v33 }
 0x436   :  { %v2167_v38 = vsel %vm921_vm4, %v2152_v37, %v2166_v60  ;;  %v2105_v41 = vpack.c.bf16 %v2007_v58, %v2007_v58  ;;  %v2018_v23 = vrot.slane %v2017_v56, 2  ;;  %v1743_v33 = vadd.f32 %v5073_v48, %v5187_v59  ;;  %v3940_v48 = vld [vmem:[%s5613_s4 + $0xa8] ss:$16 sps:$4 sm:$0xff]  }
 0x437   :  { %v2014_v31 = vadd.f32 %v2013_v16, %v2012_v45  ;;  %v2024_v14 = vadd.f32 %v2023_v17, %v2022_v19 }
 0x438   :  { %v2153_v34 = vunpack.c.l.b16 %v2105_v41  ;;  %v2019_v21 = vadd.f32 %v2018_v23, %v2017_v56 }
 0x439   :  { %v2106_v52 = vpack.c.bf16 %v2014_v31, %v2014_v31  ;;  %v2025_v18 = vrot.slane %v2024_v14, 2 }
 0x43a   :  { %v2168_v35 = vsel %vm923_vm5, %v2153_v34, %v2167_v38  ;;  %v2020_v55 = vrot.slane %v2019_v21, 1 }
 0x43b   :  { %v2154_v44 = vunpack.c.l.b16 %v2106_v52  ;;  %v2026_v50 = vadd.f32 %v2025_v18, %v2024_v14  ;;  %v1746_v14 = vadd.f32 %v5085_v30, %v5187_v59  ;;  %v1751_v52 = vadd.f32 %v5187_v59, %v5095_v39 }
 0x43c   :  { %v2021_v49 = vadd.f32 %v2020_v55, %v2019_v21  ;;  %v1864_v25 = vpop.permute.xlu1 %1863  ;;  %v1869_v26 = vpop.permute.xlu0 %1868 }
 0x43d   :  { %v2169_v53 = vsel %vm925_vm6, %v2154_v44, %v2168_v35  ;;  %v2027_v47 = vrot.slane %v2026_v50, 1  ;;  %v1957_v42 = vmul.f32 %v1864_v25, %v1719_v8  ;;  %v1958_v10 = vmul.f32 %v1869_v26, %v1722_v29  ;;  %v3942_v25 = vld [vmem:[%s5613_s4 + $0xac] ss:$16 sps:$4 sm:$0xff]  }
 0x43e   :  { %v2107_v3 = vpack.c.bf16 %v2021_v49, %v2021_v49  ;;  %v1754_v44 = vadd.f32 %v5187_v59, %v5101_v61  ;;  %2636 = vmatprep.subr.bf16.mxu0 %v3942_v25  ;;  %v1759_v61 = vadd.f32 %v5093_v7, %v5187_v59 }
 0x43f   :  { %v2028_v4 = vadd.f32 %v2027_v47, %v2026_v50  ;;  %v2029_v15 = vadd.f32 %v1958_v10, %v1957_v42  ;;  %2637 = vmatpush1.bf16.msra.mxu0 %v3940_v48 }
 0x440   :  { %v2155_v51 = vunpack.c.l.b16 %v2107_v3  ;;  %v1874_v27 = vpop.permute.xlu1 %1873  ;;  %v1879_v60 = vpop.permute.xlu0 %1878 }
 0x441   :  { %v2108_v2 = vpack.c.bf16 %v2028_v4, %v2028_v4  ;;  %v2030_v28 = vrot.slane %v2029_v15, 4  ;;  %v1959_v40 = vmul.f32 %v1874_v27, %v1727_v11  ;;  %v1960_v9 = vmul.f32 %v1879_v60, %v1730_v46 }
 0x442   :  { %v2170_v45 = vsel %vm927_vm7, %v2155_v51, %v2169_v53  ;;  %v1762_v51 = vadd.f32 %v5099_v57, %v5187_v59 }
 0x443   :  { %v2156_v24 = vunpack.c.l.b16 %v2108_v2  ;;  %v2031_v19 = vadd.f32 %v2030_v28, %v2029_v15  ;;  %v2036_v37 = vadd.f32 %v1960_v9, %v1959_v40  ;;  %v1767_v2 = vadd.f32 %v5187_v59, %v5113_v6 }
 0x444   :  { %v1884_v12 = vpop.permute.xlu1 %1883  ;;  %v1889_v58 = vpop.permute.xlu0 %1888 }
 0x445   :  { %v2032_v56 = vrot.slane %v2031_v19, 2  ;;  %v2037_v16 = vrot.slane %v2036_v37, 4  ;;  %v1961_v17 = vmul.f32 %v1884_v12, %v1735_v20  ;;  %v1962_v38 = vmul.f32 %v1889_v58, %v1738_v1 }
 0x446   :  { %v5240_v13 = vsel %vm929_vm8, %v2156_v24, %v2170_v45 }
 0x447   :  { %v2033_v41 = vadd.f32 %v2032_v56, %v2031_v19  ;;  %v2038_v23 = vadd.f32 %v2037_v16, %v2036_v37  ;;  %v2043_v31 = vadd.f32 %v1962_v38, %v1961_v17  ;;  %v1770_v19 = vadd.f32 %v5187_v59, %v5117_v36 }
 0x448   :  { %v1894_v34 = vpop.permute.xlu1 %1893  ;;  %v1899_v21 = vpop.permute.xlu0 %1898  ;;  %v1775_v36 = vadd.f32 %v5111_v54, %v5187_v59 }
 0x449   :  { %v2034_v18 = vrot.slane %v2033_v41, 1  ;;  %v2039_v8 = vrot.slane %v2038_v23, 2  ;;  %v2044_v29 = vrot.slane %v2043_v31, 4  ;;  %v1963_v35 = vmul.f32 %v1894_v34, %v1743_v33 }
 0x44a   :  { %v1964_v55 = vmul.f32 %v1899_v21, %v1746_v14 }
 0x44b   :  { %v2035_v50 = vadd.f32 %v2034_v18, %v2033_v41  ;;  %v2040_v49 = vadd.f32 %v2039_v8, %v2038_v23  ;;  %v2045_v30 = vadd.f32 %v2044_v29, %v2043_v31  ;;  %v1778_v18 = vadd.f32 %v5115_v43, %v5187_v59 }
 0x44c   :  { %v2050_v39 = vadd.f32 %v1964_v55, %v1963_v35  ;;  %v1904_v26 = vpop.permute.xlu1 %1903  ;;  %v1909_v53 = vpop.permute.xlu0 %1908 }
 0x44d   :  { %v2041_v47 = vrot.slane %v2040_v49, 1  ;;  %v2046_v42 = vrot.slane %v2045_v30, 2  ;;  %v1965_v10 = vmul.f32 %v1904_v26, %v1751_v52  ;;  %v1966_v4 = vmul.f32 %v1909_v53, %v1754_v44 }
 0x44e   :  { %v2051_v3 = vrot.slane %v2050_v39, 4  ;;  %v2109_v11 = vpack.c.bf16 %v2035_v50, %v2035_v50 }
 0x44f   :  { %v2042_v46 = vadd.f32 %v2041_v47, %v2040_v49  ;;  %v2047_v15 = vadd.f32 %v2046_v42, %v2045_v30  ;;  %v2057_v60 = vadd.f32 %v1966_v4, %v1965_v10 }
 0x450   :  { %v2052_v27 = vadd.f32 %v2051_v3, %v2050_v39  ;;  %v1914_v20 = vpop.permute.xlu1 %1913  ;;  %v1919_v1 = vpop.permute.xlu0 %1918  ;;  %v2157_v37 = vunpack.c.l.b16 %v2109_v11 }
 0x451   :  { %v2110_v28 = vpack.c.bf16 %v2042_v46, %v2042_v46  ;;  %v2048_v40 = vrot.slane %v2047_v15, 1  ;;  %v1967_v9 = vmul.f32 %v1914_v20, %v1759_v61  ;;  %v1968_v7 = vmul.f32 %v1919_v1, %v1762_v51 }
 0x452   :  { %v2053_v45 = vrot.slane %v2052_v27, 2  ;;  %v2058_v24 = vrot.slane %v2057_v60, 4 }
 0x453   :  { %v2158_v12 = vunpack.c.l.b16 %v2110_v28  ;;  %v2049_v58 = vadd.f32 %v2048_v40, %v2047_v15  ;;  %v2064_v57 = vadd.f32 %v1968_v7, %v1967_v9 }
 0x454   :  { %v2054_v56 = vadd.f32 %v2053_v45, %v2052_v27  ;;  %v2059_v16 = vadd.f32 %v2058_v24, %v2057_v60  ;;  %v1924_v17 = vpop.permute.xlu1 %1923  ;;  %v1929_v38 = vpop.permute.xlu0 %1928 }
 0x455   :  { %v2172_v41 = vsel %vm917_vm2, %v2158_v12, %v2157_v37  ;;  %v2111_v6 = vpack.c.bf16 %v2049_v58, %v2049_v58  ;;  %v2065_v33 = vrot.slane %v2064_v57, 4  ;;  %v1969_v23 = vmul.f32 %v1924_v17, %v1767_v2  ;;  %v3915_v17 = vld [vmem:[%s5613_s4 + $0x24] ss:$16 sps:$4 sm:$0xff]  }
 0x456   :  { %v2055_v31 = vrot.slane %v2054_v56, 1  ;;  %v2060_v14 = vrot.slane %v2059_v16, 2  ;;  %v1970_v34 = vmul.f32 %v1929_v38, %v1770_v19  ;;  %v3913_v38 = vld [vmem:[%s5613_s4 + $0x20] ss:$16 sps:$4 sm:$0xff]  }
 0x457   :  { %v2159_v21 = vunpack.c.l.b16 %v2111_v6  ;;  %v2066_v52 = vadd.f32 %v2065_v33, %v2064_v57  ;;  %v3927_v6 = vld [vmem:[%s5613_s4 + $0x64] ss:$16 sps:$4 sm:$0xff]  }
 0x458   :  { %v2056_v8 = vadd.f32 %v2055_v31, %v2054_v56  ;;  %v2061_v29 = vadd.f32 %v2060_v14, %v2059_v16  ;;  %v2071_v35 = vadd.f32 %v1970_v34, %v1969_v23  ;;  %v1934_v55 = vpop.permute.xlu1 %1933  ;;  %v1939_v44 = vpop.permute.xlu0 %1938  ;;  %v3907_v56 = vld [vmem:[%s5613_s4] ss:$16 sps:$4 sm:$0xff]   ;;  %v3933_v33 = vld [vmem:[%s5613_s4 + $0x84] ss:$16 sps:$4 sm:$0xff]  }
 0x459   :  { %v2173_v48 = vsel %vm919_vm3, %v2159_v21, %v2172_v41  ;;  %v2067_v50 = vrot.slane %v2066_v52, 2  ;;  %v1971_v49 = vmul.f32 %v1934_v55, %v1775_v36  ;;  %v1972_v30 = vmul.f32 %v1939_v44, %v1778_v18  ;;  %v3921_v41 = vld [vmem:[%s5613_s4 + $0x44] ss:$16 sps:$4 sm:$0xff]   ;;  %v3931_v23 = vld [vmem:[%s5613_s4 + $0x80] ss:$16 sps:$4 sm:$0xff]  }
 0x45a   :  { %v2112_v25 = vpack.c.bf16 %v2056_v8, %v2056_v8  ;;  %v2062_v39 = vrot.slane %v2061_v29, 1  ;;  %v2072_v26 = vrot.slane %v2071_v35, 4  ;;  %v3939_v31 = vld [vmem:[%s5613_s4 + $0xa4] ss:$16 sps:$4 sm:$0xff]   ;;  %v3937_v14 = vld [vmem:[%s5613_s4 + $0xa0] ss:$16 sps:$4 sm:$0xff]  }
 0x45b   :  { %v2068_v53 = vadd.f32 %v2067_v50, %v2066_v52  ;;  %v2078_v47 = vadd.f32 %v1972_v30, %v1971_v49  ;;  %v3943_v34 = vld [vmem:[%s5613_s4 + $0xc0] ss:$16 sps:$4 sm:$0xff]   ;;  %v3945_v21 = vld [vmem:[%s5613_s4 + $0xc4] ss:$16 sps:$4 sm:$0xff]   ;;  %v3946_v36 = vld [vmem:[%s5613_s4 + $0xc8] ss:$16 sps:$4 sm:$0xff]  }
 0x45c   :  { %v2160_v54 = vunpack.c.l.b16 %v2112_v25  ;;  %v2063_v42 = vadd.f32 %v2062_v39, %v2061_v29  ;;  %v2073_v10 = vadd.f32 %v2072_v26, %v2071_v35  ;;  %v3948_v52 = vld [vmem:[%s5613_s4 + $0xcc] ss:$16 sps:$4 sm:$0xff]   ;;  %v3949_v8 = vld [vmem:[%s5613_s4 + $0xe0] ss:$16 sps:$4 sm:$0xff]   ;;  %v3951_v29 = vld [vmem:[%s5613_s4 + $0xe4] ss:$16 sps:$4 sm:$0xff]  }
 0x45d   :  { %v2069_v61 = vrot.slane %v2068_v53, 1  ;;  %v2079_v43 = vrot.slane %v2078_v47, 4  ;;  %2638 = vmatprep.subr.bf16.mxu0 %v3948_v52  ;;  %v3952_v55 = vld [vmem:[%s5613_s4 + $0xe8] ss:$16 sps:$4 sm:$0xff]   ;;  %v3954_v44 = vld [vmem:[%s5613_s4 + $0xec] ss:$16 sps:$4 sm:$0xff]  }
 0x45e   :  { %v2174_v59 = vsel %vm921_vm4, %v2160_v54, %v2173_v48  ;;  %v2113_v3 = vpack.c.bf16 %v2063_v42, %v2063_v42  ;;  %v2074_v4 = vrot.slane %v2073_v10, 2  ;;  %2639 = vmatpush1.bf16.msra.mxu0 %v3946_v36  ;;  %v3438_v39 = vld [vmem:[%s5616_s7 + $0x3] ss:$0 sm:$0xff] }
 0x45f   :  { %v2070_v11 = vadd.f32 %v2069_v61, %v2068_v53  ;;  %v2080_v46 = vadd.f32 %v2079_v43, %v2078_v47  ;;  %2640 = vmatprep.subr.bf16.mxu0 %v3954_v44  ;;  %v3955_v61 = vld [vmem:[%s5614_s5 + $0x40] sm:$0xff]  }
 0x460   :  { %v2161_v15 = vunpack.c.l.b16 %v2113_v3  ;;  %v2075_v51 = vadd.f32 %v2074_v4, %v2073_v10  ;;  %v3956_v43 = vld [vmem:[%s5614_s5 + $0xc0] sm:$0xff]   ;;  %v3959_v4 = vld [vmem:[%s5614_s5 + $0x48] sm:$0xff]  }
 0x461   :  { %v2114_v27 = vpack.c.bf16 %v2070_v11, %v2070_v11  ;;  %v2081_v60 = vrot.slane %v2080_v46, 2  ;;  %v3958_v3 = vld [vmem:[%s5614_s5 + $0x80] sm:$0xff]   ;;  %v3960_v11 = vld [vmem:[%s5614_s5 + $0xc8] sm:$0xff]  }
 0x462   :  { %v2175_v20 = vsel %vm923_vm5, %v2161_v15, %v2174_v59  ;;  %v2076_v1 = vrot.slane %v2075_v51, 1  ;;  %2641 = vmatpush1.bf16.msra.mxu0 %v3952_v55  ;;  %v3957_v59 = vld [vmem:[%s5614_s5] sm:$0xff]   ;;  %v3962_v15 = vld [vmem:[%s5614_s5 + $0x88] sm:$0xff]  }
 0x463   :  { %v2162_v2 = vunpack.c.l.b16 %v2114_v27  ;;  %v2082_v28 = vadd.f32 %v2081_v60, %v2080_v46  ;;  %3621 = vmatprep.subr.bf16.mxu0 %v3956_v43  ;;  %v3961_v46 = vld [vmem:[%s5614_s5 + $0x8] sm:$0xff]   ;;  %v3964_v27 = vld [vmem:[%s5614_s5 + $0xd0] sm:$0xff]  }
 0x464   :  { %v2077_v40 = vadd.f32 %v2076_v1, %v2075_v51  ;;  %v3963_v51 = vld [vmem:[%s5614_s5 + $0x50] sm:$0xff]   ;;  %v3967_v1 = vld [vmem:[%s5614_s5 + $0x58] sm:$0xff]  }
 0x465   :  { %v2176_v9 = vsel %vm925_vm6, %v2162_v2, %v2175_v20  ;;  %v2083_v7 = vrot.slane %v2082_v28, 1  ;;  %v3965_v60 = vld [vmem:[%s5614_s5 + $0x10] sm:$0xff]   ;;  %v3968_v2 = vld [vmem:[%s5614_s5 + $0xd8] sm:$0xff]  }
 0x466   :  { %v2115_v45 = vpack.c.bf16 %v2077_v40, %v2077_v40  ;;  %v3966_v20 = vld [vmem:[%s5614_s5 + $0x90] sm:$0xff]   ;;  %v3970_v40 = vld [vmem:[%s5614_s5 + $0x98] sm:$0xff]  }
 0x467   :  { %v2084_v24 = vadd.f32 %v2083_v7, %v2082_v28  ;;  %v3969_v28 = vld [vmem:[%s5614_s5 + $0x18] sm:$0xff]   ;;  %v3972_v7 = vld [vmem:[%s5614_s5 + $0xe0] sm:$0xff]  }
 0x468   :  { %v2163_v19 = vunpack.c.l.b16 %v2115_v45  ;;  %v3973_v45 = vld [vmem:[%s5614_s5 + $0x20] sm:$0xff]  }
 0x469   :  { %v2116_v37 = vpack.c.bf16 %v2084_v24, %v2084_v24  ;;  %v3974_v24 = vld [vmem:[%s5614_s5 + $0xa0] sm:$0xff]  }
 0x46a   :  { %v2177_v12 = vsel %vm927_vm7, %v2163_v19, %v2176_v9  ;;  %v3971_v9 = vld [vmem:[%s5614_s5 + $0x60] sm:$0xff]   ;;  %v3975_v19 = vld [vmem:[%s5614_s5 + $0x68] sm:$0xff]  }
 0x46b   :  { %v2164_v58 = vunpack.c.l.b16 %v2116_v37  ;;  %v3976_v37 = vld [vmem:[%s5614_s5 + $0xe8] sm:$0xff]  }
 0x46d   :  { %v2178_v57 = vsel %vm929_vm8, %v2164_v58, %v2177_v12  ;;  %v3977_v12 = vld [vmem:[%s5614_s5 + $0x28] sm:$0xff]  }
 0x46e   :  { %v2179_v16 = vpack.c.b16 %v2178_v57, %v5240_v13  ;;  %v3919_v13 = vld [vmem:[%s5613_s4 + $0x40] ss:$16 sps:$4 sm:$0xff]   ;;  %v3978_v58 = vld [vmem:[%s5614_s5 + $0xa8] sm:$0xff]  }
 0x46f   :  { %v3979_v57 = vld [vmem:[%s5614_s5 + $0x70] sm:$0xff]  }
 0x470   :  { %3794 = vmatmul.mubr.bf16.vlgmr.msra.gmra.mrb[32].mxu1 %v2179_v16  ;;  %v3981_v16 = vld [vmem:[%s5614_s5 + $0x30] sm:$0xff]  }
 0x471   :  { %2584 = vmatpush1.bf16.msra.mxu1 %v3907_v56  ;;  %2615 = vmatprep.mubr.bf16.mxu1 %v5656_v63  ;;  %v3925_v63 = vld [vmem:[%s5613_s4 + $0x60] ss:$16 sps:$4 sm:$0xff]   ;;  %s4171_s4 = smov [#allocation2]  }
 0x472   :  { %2585 = vmatprep.subr.bf16.mxu1 %v3915_v17  ;;  %v3980_v56 = vld [vmem:[%s5614_s5 + $0xf0] sm:$0xff]   ;;  %s3368_s19 = sshll.u32 %s4171_s4, 4  ;;  %s3369_s19 = int_to_ptr.vmem [resolvable:$true] %s3368_s19 }
 0x473   :  { %v3982_v17 = vld [vmem:[%s5614_s5 + $0xb0] sm:$0xff]   ;;  %p4124_p1 = scmp.lt.s32.totalorder %s3369_s19, %s3369_s19 }
 0x475   :  { %2586 = vmatpush1.bf16.msra.mxu1 %v3913_v38  ;;  %v3983_v38 = vld [vmem:[%s5614_s5 + $0x78] sm:$0xff]  }
 0x476   :  { %2587 = vmatprep.subr.bf16.mxu1 %v3921_v41  ;;  %v3984_v41 = vld [vmem:[%s5614_s5 + $0xf8] sm:$0xff]  }
 0x479   :  { %2588 = vmatpush1.bf16.msra.mxu1 %v3919_v13  ;;  %v3985_v13 = vld [vmem:[%s5614_s5 + $0x38] sm:$0xff]  }
 0x47a   :  { %2589 = vmatprep.subr.bf16.mxu1 %v3927_v6  ;;  %v3986_v6 = vld [vmem:[%s5614_s5 + $0xb8] sm:$0xff]  }
 0x47d   :  { %2590 = vmatpush1.bf16.msra.mxu1 %v3925_v63  ;;  %v2401_v63 = vld [vmem:[%s5616_s7 + $0x9] sm:$0xf] }
 0x47e   :  { %2591 = vmatprep.subr.bf16.mxu1 %v3933_v33  ;;  %v2406_v33 = vrot.slane %v2401_v63, %v4452_v22 }
 0x481   :  { %2592 = vmatpush1.bf16.msra.mxu1 %v3931_v23  ;;  %v2414_v23 = vrot.slane %v2401_v63, %v4686_v0 }
 0x482   :  { %2593 = vmatprep.subr.bf16.mxu1 %v3939_v31  ;;  %v2410_v31 = vrot.slane %v2401_v63, %v4683_v32 }
 0x485   :  { %2594 = vmatpush1.bf16.msra.mxu1 %v3937_v14  ;;  %v2418_v14 = vrot.slane %v2401_v63, %v4691_v5 }
 0x486   :  { %2595 = vmatprep.subr.bf16.mxu1 %v3945_v21 }
 0x489   :  { %2596 = vmatpush1.bf16.msra.mxu1 %v3943_v34 }
 0x48a   :  { %2597 = vmatprep.subr.bf16.mxu1 %v3951_v29 }
 0x48d   :  { %2598 = vmatpush1.bf16.msra.mxu1 %v3949_v8 }
 0x48e   :  { %3599 = vmatprep.subr.bf16.mxu1 %v3955_v61 }
 0x4b0   :  { %v2352_v18 = vpop.f32.mrb[36].mxu0 }
 0x4b1   :  { %v3815_v35 = vpop.f32.mrb[37].mxu0 }
 0x4b2   :  { %v2355_v48 = vpop.f32.mrb[38].mxu0 }
 0x4b3   :  { %v3816_v50 = vpop.f32.mrb[39].mxu0 }
 0x543   :  { %v2263_v49 = vpop.f32.mrb[32].mxu1 }
 0x544   :  { %v2353_v30 = vadd.f32 %v2352_v18, %v2263_v49  ;;  %v3795_v25 = vpop.f32.mrb[33].mxu1 }
 0x545   :  { %v2266_v26 = vpop.f32.mrb[34].mxu1 }
 0x546   :  { %v2356_v53 = vadd.f32 %v2355_v48, %v2266_v26  ;;  %v3796_v47 = vpop.f32.mrb[35].mxu1  ;;  %v2366_v54 = vadd.f32 %v3438_v39, %v2353_v30 }
 0x548   :  { %v2367_v42 = vadd.f32 %v3438_v39, %v2356_v53 }
 0x54a   :  { %v2368_v10 = vpack.c.bf16 %v2367_v42, %v2366_v54 }
 0x54c   :  { %2616 = vmatmul.mubr.bf16.vlgmr.msra.gmra.mrb[36].mxu1 %v2368_v10  ;;  %2659 = vmatmul.mubr.bf16.vlgmr.msra.gmra.mrb[40].mxu0 %v2368_v10 }
 0x54d   :  { %3600 = vmatpush3.bf16.msra.mxu1 %v3957_v59  ;;  %3622 = vmatpush3.bf16.msra.mxu0 %v3958_v3 }
 0x54e   :  { %3601 = vmatprep.subr.bf16.mxu1 %v3959_v4  ;;  %3623 = vmatprep.subr.bf16.mxu0 %v3960_v11 }
 0x551   :  { %3602 = vmatpush3.bf16.msra.mxu1 %v3961_v46  ;;  %3624 = vmatpush3.bf16.msra.mxu0 %v3962_v15 }
 0x552   :  { %3603 = vmatprep.subr.bf16.mxu1 %v3963_v51  ;;  %3625 = vmatprep.subr.bf16.mxu0 %v3964_v27 }
 0x555   :  { %3604 = vmatpush3.bf16.msra.mxu1 %v3965_v60  ;;  %3626 = vmatpush3.bf16.msra.mxu0 %v3966_v20 }
 0x556   :  { %3605 = vmatprep.subr.bf16.mxu1 %v3967_v1  ;;  %3627 = vmatprep.subr.bf16.mxu0 %v3968_v2 }
 0x559   :  { %3606 = vmatpush3.bf16.msra.mxu1 %v3969_v28  ;;  %3628 = vmatpush3.bf16.msra.mxu0 %v3970_v40 }
 0x55a   :  { %3607 = vmatprep.subr.bf16.mxu1 %v3971_v9  ;;  %3629 = vmatprep.subr.bf16.mxu0 %v3972_v7 }
 0x55d   :  { %3608 = vmatpush3.bf16.msra.mxu1 %v3973_v45  ;;  %3630 = vmatpush3.bf16.msra.mxu0 %v3974_v24 }
 0x55e   :  { %3609 = vmatprep.subr.bf16.mxu1 %v3975_v19  ;;  %3631 = vmatprep.subr.bf16.mxu0 %v3976_v37 }
 0x561   :  { %3610 = vmatpush3.bf16.msra.mxu1 %v3977_v12  ;;  %3632 = vmatpush3.bf16.msra.mxu0 %v3978_v58 }
 0x562   :  { %3611 = vmatprep.subr.bf16.mxu1 %v3979_v57  ;;  %3633 = vmatprep.subr.bf16.mxu0 %v3980_v56 }
 0x565   :  { %3612 = vmatpush3.bf16.msra.mxu1 %v3981_v16  ;;  %3634 = vmatpush3.bf16.msra.mxu0 %v3982_v17 }
 0x566   :  { %3613 = vmatprep.subr.bf16.mxu1 %v3983_v38  ;;  %3635 = vmatprep.subr.bf16.mxu0 %v3984_v41 }
 0x569   :  { %3614 = vmatpush3.bf16.msra.mxu1 %v3985_v13  ;;  %3636 = vmatpush3.bf16.msra.mxu0 %v3986_v6 }
 0x56a   :  { %3817 = vmatprep.subr.bf16.mxu1 %v5645_v62  ;;  %3837 = vmatprep.subr.bf16.mxu0 %v5645_v62 }
 0x61f   :  { %v2617_v34 = vpop.f32.mrb[36].mxu1  ;;  %v2660_v21 = vpop.f32.mrb[40].mxu0 }
 0x620   :  { %v5442_v36 = vadd.f32 %v2617_v34, %v2406_v33  ;;  %v5444_v52 = vadd.f32 %v2660_v21, %v2414_v23  ;;  %v2619_v18 = vpop.f32.mrb[37].mxu1  ;;  %v2662_v8 = vpop.f32.mrb[41].mxu0 }
 0x621   :  { %v5446_v29 = vadd.f32 %v2619_v18, %v2410_v31  ;;  %v5448_v35 = vadd.f32 %v2662_v8, %v2418_v14  ;;  %v2621_v55 = vpop.f32.mrb[38].mxu1  ;;  %v2664_v22 = vpop.f32.mrb[42].mxu0 }
 0x622   :  { %v2669_v0 = vmul.f32 %v5442_v36, %v5442_v36  ;;  %v2671_v32 = vmul.f32 %v5444_v52, %v5444_v52  ;;  %v5454_v5 = vadd.f32 %v2621_v55, %v2406_v33  ;;  %v5456_v44 = vadd.f32 %v2664_v22, %v2414_v23  ;;  %v2623_v48 = vpop.f32.mrb[39].mxu1  ;;  %v2666_v50 = vpop.f32.mrb[43].mxu0 }
 0x623   :  { %v2670_v49 = vmul.f32 %v5446_v29, %v5446_v29  ;;  %v2672_v30 = vmul.f32 %v5448_v35, %v5448_v35  ;;  %v5462_v25 = vadd.f32 %v2623_v48, %v2410_v31  ;;  %v5464_v39 = vadd.f32 %v2666_v50, %v2418_v14 }
 0x624   :  { %v2677_v26 = vmul.f32 %v2669_v0, %v5442_v36  ;;  %v2679_v53 = vmul.f32 %v2671_v32, %v5444_v52  ;;  %v2673_v47 = vmul.f32 %v5454_v5, %v5454_v5  ;;  %v2675_v54 = vmul.f32 %v5456_v44, %v5456_v44 }
 0x625   :  { %v2678_v42 = vmul.f32 %v2670_v49, %v5446_v29  ;;  %v2680_v10 = vmul.f32 %v2672_v30, %v5448_v35  ;;  %v2674_v61 = vmul.f32 %v5462_v25, %v5462_v25  ;;  %v2676_v43 = vmul.f32 %v5464_v39, %v5464_v39 }
 0x626   :  { %v2685_v59 = vmul.f32 0.044715, %v2677_v26  ;;  %v2687_v3 = vmul.f32 0.044715, %v2679_v53  ;;  %v2681_v4 = vmul.f32 %v2673_v47, %v5454_v5  ;;  %v2683_v11 = vmul.f32 %v2675_v54, %v5456_v44 }
 0x627   :  { %v2686_v46 = vmul.f32 0.044715, %v2678_v42  ;;  %v2688_v15 = vmul.f32 0.044715, %v2680_v10  ;;  %v2682_v51 = vmul.f32 %v2674_v61, %v5462_v25  ;;  %v2684_v27 = vmul.f32 %v2676_v43, %v5464_v39 }
 0x628   :  { %v2693_v60 = vadd.f32 %v2685_v59, %v5442_v36  ;;  %v2695_v20 = vadd.f32 %v2687_v3, %v5444_v52  ;;  %v2689_v1 = vmul.f32 0.044715, %v2681_v4  ;;  %v2691_v2 = vmul.f32 0.044715, %v2683_v11 }
 0x629   :  { %v2694_v28 = vadd.f32 %v2686_v46, %v5446_v29  ;;  %v2696_v40 = vadd.f32 %v2688_v15, %v5448_v35  ;;  %v2690_v9 = vmul.f32 0.044715, %v2682_v51  ;;  %v2692_v7 = vmul.f32 0.044715, %v2684_v27 }
 0x62a   :  { %v2701_v45 = vmul.f32 0.7978846, %v2693_v60  ;;  %v2703_v24 = vmul.f32 0.7978846, %v2695_v20  ;;  %v2697_v19 = vadd.f32 %v2689_v1, %v5454_v5  ;;  %v2699_v37 = vadd.f32 %v2691_v2, %v5456_v44 }
 0x62b   :  { %v2702_v12 = vmul.f32 0.7978846, %v2694_v28  ;;  %v2704_v58 = vmul.f32 0.7978846, %v2696_v40  ;;  %v2698_v57 = vadd.f32 %v2690_v9, %v5462_v25  ;;  %v2700_v56 = vadd.f32 %v2692_v7, %v5464_v39 }
 0x62c   :  { %4099 = vtanh.f32 %v2701_v45  ;;  %v2705_v16 = vmul.f32 0.7978846, %v2697_v19  ;;  %v2707_v17 = vmul.f32 0.7978846, %v2699_v37  ;;  %v3987_v19 = vld [vmem:[%s5615_s6] ss:$8 sps:$4 sm:$0xff]  }
 0x62d   :  { %4101 = vtanh.f32 %v2703_v24  ;;  %v2706_v38 = vmul.f32 0.7978846, %v2698_v57  ;;  %v2708_v41 = vmul.f32 0.7978846, %v2700_v56  ;;  %v3988_v37 = vld [vmem:[%s5615_s6 + $0x10] ss:$8 sps:$4 sm:$0xff]  }
 0x62e   :  { %4103 = vtanh.f32 %v2702_v12 }
 0x62f   :  { %4105 = vtanh.f32 %v2704_v58 }
 0x630   :  { %4107 = vtanh.f32 %v2705_v16 }
 0x631   :  { %4109 = vtanh.f32 %v2707_v17 }
 0x632   :  { %4111 = vtanh.f32 %v2706_v38 }
 0x633   :  { %4113 = vtanh.f32 %v2708_v41 }
 0x636   :  { %v4100_v13 = vpop.eup %4099 }
 0x637   :  { %v4102_v6 = vpop.eup %4101  ;;  %v2717_v63 = vadd.f32 1.0, %v4100_v13  ;;  %v3989_v13 = vld [vmem:[%s5615_s6 + $0x20] ss:$8 sps:$4 sm:$0xff]  }
 0x638   :  { %v4104_v33 = vpop.eup %4103  ;;  %v2719_v23 = vadd.f32 1.0, %v4102_v6  ;;  %v3990_v6 = vld [vmem:[%s5615_s6 + $0x30] ss:$8 sps:$4 sm:$0xff]  }
 0x639   :  { %v4106_v31 = vpop.eup %4105  ;;  %v2718_v14 = vadd.f32 1.0, %v4104_v33  ;;  %v2725_v8 = vmul.f32 0.5, %v2717_v63  ;;  %v3991_v63 = vld [vmem:[%s5615_s6 + $0x40] ss:$8 sps:$4 sm:$0xff]   ;;  %v3992_v33 = vld [vmem:[%s5615_s6 + $0x50] ss:$8 sps:$4 sm:$0xff]  }
 0x63a   :  { %v4108_v34 = vpop.eup %4107  ;;  %v2720_v21 = vadd.f32 1.0, %v4106_v31  ;;  %v2727_v0 = vmul.f32 0.5, %v2719_v23  ;;  %v3993_v23 = vld [vmem:[%s5615_s6 + $0x60] ss:$8 sps:$4 sm:$0xff]   ;;  %v3995_v31 = vld [vmem:[%s5615_s6 + $0x4] ss:$8 sps:$4 sm:$0xff]  }
 0x63b   :  { %v4110_v18 = vpop.eup %4109  ;;  %v2721_v55 = vadd.f32 1.0, %v4108_v34  ;;  %v2726_v30 = vmul.f32 0.5, %v2718_v14  ;;  %v2733_v54 = vmul.f32 %v2725_v8, %v5442_v36  ;;  %v3996_v14 = vld [vmem:[%s5615_s6 + $0x14] ss:$8 sps:$4 sm:$0xff]   ;;  %v3994_v34 = vld [vmem:[%s5615_s6 + $0x70] ss:$8 sps:$4 sm:$0xff]  }
 0x63c   :  { %v4112_v22 = vpop.eup %4111  ;;  %v2723_v32 = vadd.f32 1.0, %v4110_v18  ;;  %v2728_v47 = vmul.f32 0.5, %v2720_v21  ;;  %v2735_v61 = vmul.f32 %v2727_v0, %v5444_v52  ;;  %v3997_v21 = vld [vmem:[%s5615_s6 + $0x24] ss:$8 sps:$4 sm:$0xff]   ;;  %v3998_v18 = vld [vmem:[%s5615_s6 + $0x34] ss:$8 sps:$4 sm:$0xff]  }
 0x63d   :  { %v4114_v48 = vpop.eup %4113  ;;  %v2729_v50 = vmul.f32 0.5, %v2721_v55  ;;  %v2722_v49 = vadd.f32 1.0, %v4112_v22  ;;  %v2734_v3 = vmul.f32 %v2726_v30, %v5446_v29  ;;  %v3999_v8 = vld [vmem:[%s5615_s6 + $0x44] ss:$8 sps:$4 sm:$0xff]   ;;  %v4000_v55 = vld [vmem:[%s5615_s6 + $0x54] ss:$8 sps:$4 sm:$0xff]  }
 0x63e   :  { %v2731_v26 = vmul.f32 0.5, %v2723_v32  ;;  %v2724_v53 = vadd.f32 1.0, %v4114_v48  ;;  %v2736_v46 = vmul.f32 %v2728_v47, %v5448_v35  ;;  %v3471_v35 = vld [vmem:[%s5616_s7 + $0x4] ss:$0 sm:$0xff] }
 0x63f   :  { %v2737_v42 = vmul.f32 %v2729_v50, %v5454_v5  ;;  %v2730_v10 = vmul.f32 0.5, %v2722_v49 }
 0x640   :  { %v2739_v43 = vmul.f32 %v2731_v26, %v5456_v44  ;;  %v2732_v59 = vmul.f32 0.5, %v2724_v53  ;;  %v3504_v26 = vld [vmem:[%s5616_s7 + $0x5] ss:$0 sm:$0xff] }
 0x641   :  { %v2738_v4 = vmul.f32 %v2730_v10, %v5462_v25  ;;  %v2741_v11 = vpack.c.bf16 %v2737_v42, %v2733_v54  ;;  %v3505_v54 = vld [vmem:[%s5616_s7 + $0x6] ss:$0 sm:$0xff] }
 0x642   :  { %v2740_v15 = vmul.f32 %v2732_v59, %v5464_v39  ;;  %v2743_v51 = vpack.c.bf16 %v2739_v43, %v2735_v61 }
 0x643   :  { %v2742_v27 = vpack.c.bf16 %v2738_v4, %v2734_v3  ;;  %v4001_v4 = vld [vmem:[%s5615_s6 + $0x64] ss:$8 sps:$4 sm:$0xff]  }
 0x644   :  { %v2744_v36 = vpack.c.bf16 %v2740_v15, %v2736_v46  ;;  %v3506_v46 = vld [vmem:[%s5616_s7 + $0x7] ss:$0 sm:$0xff] }
 0x645   :  { %3040 = vmatprep.mubr.bf16.mxu1 %v2742_v27 }
 0x646   :  { %3081 = vmatprep.mubr.bf16.mxu0 %v2744_v36  ;;  %3041 = vmatmul.mubr.bf16.vlgmr.msra.gmra.mrb[40].mxu1 %v2741_v11  ;;  %v4002_v11 = vld [vmem:[%s5615_s6 + $0x74] ss:$8 sps:$4 sm:$0xff]   ;;  %s4119_s6 = scalar_lea.vmem %s3369_s19, 256 }
 0x647   :  { %3082 = vmatmul.mubr.bf16.vlgmr.msra.gmra.mrb[44].mxu0 %v2743_v51  ;;  %3833 = vmatprep.mubr.msk.bf16.mxu1 %vm4168_vm0, %v5645_v62  ;;  %p4120_p0 = scmp.ne.s32.totalorder %s3369_s19, %s4119_s6  ;;  %p4125_p2 = scmp.lt.s32.totalorder %s4119_s6, %s4119_s6 }
 0x648   :  { %3853 = vmatprep.mubr.msk.bf16.mxu0 %vm4168_vm0, %v5645_v62  ;;  %3818 = vmatpush3.bf16.msra.mxu1 %v3987_v19 }
 0x649   :  { %3819 = vmatprep.subr.bf16.mxu1 %v5645_v62  ;;  %3838 = vmatpush3.bf16.msra.mxu0 %v3995_v31  ;;  %p4126_p3 = por %p4125_p2, %p4124_p1 }
 0x64a   :  { %3839 = vmatprep.subr.bf16.mxu0 %v5645_v62 }
 0x64b   :  { %p4127_p4 = pnand %p4126_p3, %p4120_p0 }
 0x64c   :  { %3820 = vmatpush3.bf16.msra.mxu1 %v3988_v37 }
 0x64d   :  { %3821 = vmatprep.subr.bf16.mxu1 %v5645_v62  ;;  %3840 = vmatpush3.bf16.msra.mxu0 %v3996_v14 }
 0x64e   :  { %3841 = vmatprep.subr.bf16.mxu0 %v5645_v62 }
 0x650   :  { %3822 = vmatpush3.bf16.msra.mxu1 %v3989_v13 }
 0x651   :  { %3823 = vmatprep.subr.bf16.mxu1 %v5645_v62  ;;  %3842 = vmatpush3.bf16.msra.mxu0 %v3997_v21 }
 0x652   :  { %3843 = vmatprep.subr.bf16.mxu0 %v5645_v62 }
 0x654   :  { %3824 = vmatpush3.bf16.msra.mxu1 %v3990_v6 }
 0x655   :  { %3825 = vmatprep.subr.bf16.mxu1 %v5645_v62  ;;  %3844 = vmatpush3.bf16.msra.mxu0 %v3998_v18 }
 0x656   :  { %3845 = vmatprep.subr.bf16.mxu0 %v5645_v62 }
 0x658   :  { %3826 = vmatpush3.bf16.msra.mxu1 %v3991_v63 }
 0x659   :  { %3827 = vmatprep.subr.bf16.mxu1 %v5645_v62  ;;  %3846 = vmatpush3.bf16.msra.mxu0 %v3999_v8 }
 0x65a   :  { %3847 = vmatprep.subr.bf16.mxu0 %v5645_v62 }
 0x65c   :  { %3828 = vmatpush3.bf16.msra.mxu1 %v3992_v33 }
 0x65d   :  { %3829 = vmatprep.subr.bf16.mxu1 %v5645_v62  ;;  %3848 = vmatpush3.bf16.msra.mxu0 %v4000_v55 }
 0x65e   :  { %3849 = vmatprep.subr.bf16.mxu0 %v5645_v62 }
 0x660   :  { %3830 = vmatpush3.bf16.msra.mxu1 %v3993_v23 }
 0x661   :  { %3831 = vmatprep.subr.bf16.mxu1 %v5645_v62  ;;  %3850 = vmatpush3.bf16.msra.mxu0 %v4001_v4 }
 0x662   :  { %3851 = vmatprep.subr.bf16.mxu0 %v5645_v62 }
 0x664   :  { %3832 = vmatpush3.bf16.msra.mxu1 %v3994_v34 }
 0x665   :  { %3852 = vmatpush3.bf16.msra.mxu0 %v4002_v11 }
 0x719   :  { %v3615_v52 = vpop.f32.mrb[40].mxu1 }
 0x71a   :  { %v3637_v29 = vpop.f32.mrb[44].mxu0  ;;  %v3616_v5 = vpop.f32.mrb[41].mxu1 }
 0x71b   :  { %v3617_v44 = vadd.f32 %v3616_v5, %v3615_v52  ;;  %v3638_v25 = vpop.f32.mrb[45].mxu0  ;;  %v3618_v39 = vpop.f32.mrb[42].mxu1 }
 0x71c   :  { %v3639_v60 = vadd.f32 %v3638_v25, %v3637_v29  ;;  %v3640_v20 = vpop.f32.mrb[46].mxu0  ;;  %v3619_v1 = vpop.f32.mrb[43].mxu1 }
 0x71d   :  { %v3043_v2 = vadd.f32 %v3617_v44, %v3471_v35  ;;  %v3620_v28 = vadd.f32 %v3619_v1, %v3618_v39  ;;  %v3641_v40 = vpop.f32.mrb[47].mxu0 }
 0x71e   :  { %v3642_v9 = vadd.f32 %v3641_v40, %v3640_v20 }
 0x71f   :  { %v3084_v7 = vadd.f32 %v3639_v60, %v3043_v2  ;;  %v3046_v45 = vadd.f32 %v3620_v28, %v3471_v35 }
 0x721   :  { %3090 = vadd.xlane.f32.xlu1 %v3084_v7  ;;  %v3087_v24 = vadd.f32 %v3642_v9, %v3046_v45 }
 0x723   :  { %3092 = vadd.xlane.f32.xlu0 %v3087_v24 }
 0x7ae   :  { %v3091_v12 = vpop.xlane.xlu1 %3090 }
 0x7af   :  { %v3095_v58 = vmul.f32 0.0078125, %v3091_v12 }
 0x7b0   :  { %v3093_v57 = vpop.xlane.xlu0 %3092 }
 0x7b1   :  { %v3097_v56 = vsub.f32 %v3084_v7, %v3095_v58  ;;  %v3096_v16 = vmul.f32 0.0078125, %v3093_v57 }
 0x7b3   :  { %v3098_v17 = vsub.f32 %v3087_v24, %v3096_v16  ;;  %v3099_v38 = vmul.f32 %v3097_v56, %v3097_v56 }
 0x7b5   :  { %3101 = vadd.xlane.f32.xlu0 %v3099_v38  ;;  %v3100_v41 = vmul.f32 %v3098_v17, %v3098_v17 }
 0x7b7   :  { %3103 = vadd.xlane.f32.xlu1 %v3100_v41 }
 0x842   :  { %v3102_v22 = vpop.xlane.xlu0 %3101 }
 0x843   :  { %v3105_v0 = vmul.f32 0.0078125, %v3102_v22 }
 0x844   :  { %v3104_v32 = vpop.xlane.xlu1 %3103 }
 0x845   :  { %v3107_v48 = vadd.f32 1e-05, %v3105_v0  ;;  %v3106_v50 = vmul.f32 0.0078125, %v3104_v32 }
 0x847   :  { %4115 = vrsqrt.f32 %v3107_v48  ;;  %v3108_v49 = vadd.f32 1e-05, %v3106_v50 }
 0x849   :  { %4117 = vrsqrt.f32 %v3108_v49 }
 0x851   :  { %v4116_v30 = vpop.eup %4115 }
 0x852   :  { %v3111_v53 = vmul.f32 %v4116_v30, %v3097_v56 }
 0x853   :  { %v4118_v47 = vpop.eup %4117 }
 0x854   :  { %v3112_v42 = vmul.f32 %v4118_v47, %v3098_v17  ;;  %v3120_v10 = vmul.f32 %v3504_v26, %v3111_v53 }
 0x856   :  { %v3121_v61 = vmul.f32 %v3504_v26, %v3112_v42  ;;  %v3129_v43 = vadd.f32 %v3505_v54, %v3120_v10 }
 0x858   :  { %v3130_v59 = vadd.f32 %v3505_v54, %v3121_v61  ;;  %3131 = vst [vmem:[#allocation2] sm:$0xff] %v3129_v43 }
 0x85a   :  { %v3133_v3 = vpack.c.bf16 %v3130_v59, %v3129_v43  ;;  %3132 = vst [vmem:[#allocation2 + $0x8] sm:$0xff] %v3130_v59 }
 0x85c   :  { %3834 = vmatmul.mubr.bf16.vlgmr.msra.gmra.mrb[44].mxu1 %v3133_v3 }
 0x92f   :  { %v3239_v15 = vpop.f32.mrb[44].mxu1 }
 0x930   :  { %v3240_v51 = vadd.f32 %v3506_v46, %v3239_v15  ;;  %v3835_v27 = vpop.f32.mrb[45].mxu1 }
 0x931   :  { %v3242_v36 = vpop.f32.mrb[46].mxu1 }
 0x932   :  { %v3243_v52 = vadd.f32 %v3506_v46, %v3242_v36  ;;  %v3836_v29 = vpop.f32.mrb[47].mxu1  ;;  %v3246_v35 = vmax.f32 %v3240_v51, 0.0 }
 0x934   :  { %v3247_v5 = vmax.f32 %v3243_v52, 0.0 }
 0x936   :  { %v3248_v44 = vpack.c.bf16 %v3247_v5, %v3246_v35 }
 0x938   :  { %3854 = vmatmul.mubr.bf16.vlgmr.msra.gmra.mrb[48].mxu0 %v3248_v44 }
 0x939   :  { %4130 = shalt.err (!%p4127_p4)
}
 0x93a   :  { %s4131_s1 = scalar_lea.hbm %s5617_s8, 256 }
 0x93b   :  { %p4132_p5 = scmp.ne.s32.totalorder %s5617_s8, %s4131_s1  ;;  %p4135_p6 = scmp.lt.u32.totalorder %s4131_s1, %s5617_s8 }
 0x93d   :  { %p4137_p7 = pnand %p4135_p6, %p4132_p5 }
 0x93f   :  { %4140 = shalt.err (!%p4137_p7)
}
 0x940   :  { %s4172_s26 = smov 128   ;;  %s4173_s27 = smov 8   ;;  %v3515_v62 = vld [vmem:[%s5616_s7 + $0x8] ss:$0 sm:$0xff] }
 0x941   :  { %3374 = dma.vmem_to_hbm [thread:$0]  %s3369_s19, 256, %s5617_s8, [#allocation3], %s4172_s26, %s4172_s26, %s4173_s27  }
 0x942   :  { %s4174_s3 = smov [#allocation4]  }
 0x943   :  { %s3380_s10 = sshll.u32 %s4174_s3, 4  ;;  %s3381_s10 = int_to_ptr.vmem [resolvable:$true] %s3380_s10 }
 0x944   :  { %s4141_s11 = scalar_lea.vmem %s3381_s10, 256  ;;  %p4146_p9 = scmp.lt.s32.totalorder %s3381_s10, %s3381_s10 }
 0x945   :  { %p4142_p8 = scmp.ne.s32.totalorder %s3381_s10, %s4141_s11  ;;  %p4147_p10 = scmp.lt.s32.totalorder %s4141_s11, %s4141_s11 }
 0x947   :  { %p4148_p11 = por %p4147_p10, %p4146_p9 }
 0x949   :  { %p4149_p12 = pnand %p4148_p11, %p4142_p8 }
 0xa0b   :  { %v3354_v25 = vpop.f32.mrb[48].mxu0 }
 0xa0c   :  { %v3355_v39 = vadd.f32 %v3515_v62, %v3354_v25  ;;  %v3855_v60 = vpop.f32.mrb[49].mxu0 }
 0xa0d   :  { %v3357_v20 = vpop.f32.mrb[50].mxu0 }
 0xa0e   :  { %3361 = vst [vmem:[#allocation4] sm:$0xff] %v3355_v39  ;;  %v3358_v1 = vadd.f32 %v3515_v62, %v3357_v20  ;;  %v3856_v2 = vpop.f32.mrb[51].mxu0 }
 0xa10   :  { %3362 = vst [vmem:[#allocation4 + $0x8] sm:$0xff] %v3358_v1 }
 0xa11   :  { %4152 = shalt.err (!%p4149_p12)
}
 0xa12   :  { %s4153_s12 = scalar_lea.hbm %s5618_s9, 256 }
 0xa13   :  { %p4154_p13 = scmp.ne.s32.totalorder %s5618_s9, %s4153_s12  ;;  %p4157_p0 = scmp.lt.u32.totalorder %s4153_s12, %s5618_s9 }
 0xa15   :  { %p4159_p1 = pnand %p4157_p0, %p4154_p13 }
 0xa17   :  { %4162 = shalt.err (!%p4159_p1)
}
 0xa18   :  { %3386 = dma.vmem_to_hbm [thread:$0]  %s3381_s10, 256, %s5618_s9, [#allocation5], %s4172_s26, %s4172_s26, %s4173_s27  }
 0xa19   :  { %4163 = dma.done.wait [#allocation3], 256  }
 0xa1a   :  { %4164 = vsyncadd [#allocation3], 4294967040 }
 0xa1b   :  { %4165 = dma.done.wait [#allocation5], 256  }
 0xa1c   :  { %4166 = vsyncadd [#allocation5], 4294967040 }
 0xa1d   :  { %3393 = vsyncpa [#allocation3], 1 }
 0xa1e   :  { %3394 = vsyncpa [#allocation5], 1 }

</bundles_post_ra>
